<compile_context>
chip_gen: v7x
topology: tpu7x:2x2x1
jax: 0.10.0
libtpu: 0.0.40
codegen_flags: <defaults>
</compile_context>

<pallas_src>
import numpy as np
import jax
import jax.numpy as jnp
from jax import lax
from jax.experimental import pallas as pl
from jax.experimental.pallas import tpu as pltpu

# ---- model config (small shapes consistent with the module) ----
N_MEL = 16      # n_mel_channels (in_dim)
HID = 32        # style_hidden
OUT = 32        # style_vector_dim
K = 5           # style_kernel_size
PAD = (K - 1) // 2
NH = 2          # style_head
DK = HID // NH  # per-head dim
B = 2
T = 16
C = B * HID                  # 64: lane-packed (batch-folded) channel width
TEMP = float(HID) ** 0.5     # ScaledDotProductAttention temperature = sqrt(d_model)
INV_TEMP = 1.0 / TEMP


def _sigmoid(x):
    # tanh-based sigmoid: exact in f32, single EUP push, no VALU divide
    return 0.5 * (jnp.tanh(0.5 * x) + 1.0)


def _mish_fast(x):
    # mish(x) = x * tanh(softplus(x)) with a single exp:
    #   t = exp(-|x|);  e^{-2*softplus(x)} = u / (1+t)^2  with  u = t^2 if x>=0 else 1
    #   tanh(softplus(x)) = ((1+t)^2 - u) / ((1+t)^2 + u)
    t = jnp.exp(-jnp.abs(x))
    tp1_sq = (1.0 + t) * (1.0 + t)
    u = jnp.where(x >= 0, t * t, 1.0)
    return x * (tp1_sq - u) / (tp1_sq + u)


def mel_style_kernel(x_ref, w_lin_ref, w_conv_ref, o_ref):
    ones_col = jnp.ones((T, 1), jnp.float32)          # augmented-GEMM ones column
    zpad = jnp.zeros((PAD, C), jnp.float32)           # conv time padding (hoisted, reused)

    # ---------- spectral: Linear -> Mish -> Linear -> Mish (biases folded) ----------
    x_aug = x_ref[...]                                                  # (T, C+1), ones col packed host-side
    h = _mish_fast(jnp.dot(x_aug, w_lin_ref[:, 0:C],
                           preferred_element_type=jnp.float32))          # (T, C)
    h = _mish_fast(jnp.dot(jnp.concatenate([h, ones_col], axis=-1),
                           w_lin_ref[:, C:2 * C],
                           preferred_element_type=jnp.float32))          # (T, C)

    # ---------- temporal: 2x Conv1dGLU, each as ONE im2col matmul ----------
    def conv_glu(h, w_blk):
        hp = jnp.concatenate([zpad, h, zpad], axis=0)                    # (T+2*PAD, C)
        xcat = jnp.concatenate([hp[k:k + T, :] for k in range(K)] + [ones_col],
                               axis=-1)                                  # (T, K*C+1)
        y = jnp.dot(xcat, w_blk, preferred_element_type=jnp.float32)     # (T, 2*C)
        a = y[:, :C]        # values, batch-packed
        g = y[:, C:]        # gates,  batch-packed
        return h + a * _sigmoid(g)

    h = conv_glu(h, w_conv_ref[:, 0:2 * C])
    h = conv_glu(h, w_conv_ref[:, 2 * C:4 * C])                          # (T, C)

    # ---------- multi-head self-attention with residual (mask=None) ----------
    residual = h
    qkv = jnp.dot(jnp.concatenate([h, ones_col], axis=-1),
                  w_lin_ref[:, 2 * C:5 * C],
                  preferred_element_type=jnp.float32)                    # (T, 3*C)
    heads = []
    for p in range(B * NH):                                              # static unroll over (batch, head)
        q = qkv[:, p * DK:(p + 1) * DK]
        kk = qkv[:, C + p * DK:C + (p + 1) * DK]
        v = qkv[:, 2 * C + p * DK:2 * C + (p + 1) * DK]
        s = lax.dot_general(q, kk, (((1,), (1,)), ((), ())),
                            preferred_element_type=jnp.float32) * INV_TEMP
        m = jnp.max(s, axis=-1, keepdims=True)
        e = jnp.exp(s - m)
        pr = e * pl.reciprocal(jnp.sum(e, axis=-1, keepdims=True), approx=True)
        heads.append(jnp.dot(pr, v, preferred_element_type=jnp.float32))  # (T, DK)
    att = jnp.concatenate(heads + [ones_col], axis=-1)                   # (T, C+1)
    h = residual + jnp.dot(att, w_lin_ref[:, 5 * C:6 * C],
                           preferred_element_type=jnp.float32)           # (T, C)

    # ---------- mean pool over time, then fc (exact swap: fc is affine, no mask) ----------
    hm = jnp.mean(h, axis=0, keepdims=True)                              # (1, C)
    hm_aug = jnp.concatenate([hm, jnp.ones((1, 1), jnp.float32)], axis=-1)
    o_ref[...] = jnp.dot(hm_aug, w_lin_ref[:, 6 * C:6 * C + B * OUT],
                         preferred_element_type=jnp.float32)             # (1, B*OUT)


def init_params(key):
    """Deterministic, PyTorch-default-like uniform init. Shapes match the module."""
    ks = iter(jax.random.split(key, 32))

    def u(k, shape, fan_in):
        bound = 1.0 / (fan_in ** 0.5)
        return jax.random.uniform(k, shape, jnp.float32, -bound, bound)

    w1 = u(next(ks), (N_MEL, HID), N_MEL); b1 = u(next(ks), (1, HID), N_MEL)
    w2 = u(next(ks), (HID, HID), HID);     b2 = u(next(ks), (1, HID), HID)

    def conv_params():
        fan = HID * K
        ca = u(next(ks), (K, HID, HID), fan); cba = u(next(ks), (1, HID), fan)
        cg = u(next(ks), (K, HID, HID), fan); cbg = u(next(ks), (1, HID), fan)
        return ca, cba, cg, cbg

    ca1, cba1, cg1, cbg1 = conv_params()
    ca2, cba2, cg2, cbg2 = conv_params()

    wq = u(next(ks), (NH, HID, DK), HID); bq = u(next(ks), (NH, 1, DK), HID)
    wk = u(next(ks), (NH, HID, DK), HID); bk = u(next(ks), (NH, 1, DK), HID)
    wv = u(next(ks), (NH, HID, DK), HID); bv = u(next(ks), (NH, 1, DK), HID)
    wo = u(next(ks), (NH, DK, HID), HID); bo = u(next(ks), (1, HID), HID)
    wf = u(next(ks), (HID, OUT), HID);    bf = u(next(ks), (1, OUT), HID)

    return (w1, b1, w2, b2,
            ca1, cba1, cg1, cbg1, ca2, cba2, cg2, cbg2,
            wq, bq, wk, bk, wv, bv, wo, bo, wf, bf)


def pack_params(params):
    """Pack the 22 logical parameters into 2 batch-block-diagonal, bias-augmented slabs."""
    (w1, b1, w2, b2,
     ca1, cba1, cg1, cbg1, ca2, cba2, cg2, cbg2,
     wq, bq, wk, bk, wv, bv, wo, bo, wf, bf) = [np.asarray(p) for p in params]

    R = C + 1                                        # 65 rows: C packed features + 1 bias row

    def block_diag_aug(w, bvec, in_dim, out_dim):
        # per-batch block-diagonal weight with the bias folded into the last row
        slab = np.zeros((R, B * out_dim), np.float32)
        for b_ in range(B):
            slab[b_ * HID:b_ * HID + in_dim, b_ * out_dim:(b_ + 1) * out_dim] = w
            slab[C, b_ * out_dim:(b_ + 1) * out_dim] = bvec
        return slab

    w_spec1 = block_diag_aug(w1, b1[0], N_MEL, HID)
    w_spec2 = block_diag_aug(w2, b2[0], HID, HID)

    # fused QKV: output lanes = [Q | K | V], each block ordered (b0h0, b0h1, b1h0, b1h1)
    w_qkv = np.zeros((R, 3 * C), np.float32)
    for b_ in range(B):
        for hd in range(NH):
            p = b_ * NH + hd
            for blk, (wm, bm) in enumerate(((wq, bq), (wk, bk), (wv, bv))):
                cols = slice(blk * C + p * DK, blk * C + (p + 1) * DK)
                w_qkv[b_ * HID:(b_ + 1) * HID, cols] = wm[hd]
                w_qkv[C, cols] = bm[hd, 0]

    w_o = block_diag_aug(np.concatenate([wo[0], wo[1]], axis=0), bo[0], HID, HID)
    w_f = block_diag_aug(wf, bf[0], HID, OUT)

    # [spec1(64) | spec2(64) | qkv(192) | wo(64) | wf(64)]  -> (65, 448)
    w_lin = np.concatenate([w_spec1, w_spec2, w_qkv, w_o, w_f], axis=1)

    def conv_slab(ca, cba, cg, cbg):
        # im2col weight: rows = K taps x (B x HID) input lanes (+ bias row),
        # cols = [values b0|b1 (0:C)] [gates b0|b1 (C:2C)]
        slab = np.zeros((K * C + 1, 2 * C), np.float32)
        for k in range(K):
            for b_ in range(B):
                rows = slice(k * C + b_ * HID, k * C + (b_ + 1) * HID)
                slab[rows, b_ * HID:(b_ + 1) * HID] = ca[k]
                slab[rows, C + b_ * HID:C + (b_ + 1) * HID] = cg[k]
        for b_ in range(B):
            slab[K * C, b_ * HID:(b_ + 1) * HID] = cba[0]
            slab[K * C, C + b_ * HID:C + (b_ + 1) * HID] = cbg[0]
        return slab

    w_conv = np.concatenate([conv_slab(ca1, cba1, cg1, cbg1),
                             conv_slab(ca2, cba2, cg2, cbg2)], axis=1)   # (321, 256)

    return jnp.asarray(w_lin), jnp.asarray(w_conv)


def pack_x(x):
    # (B, T, N_MEL) -> (T, C+1): batch b on lanes [b*HID, b*HID+N_MEL), ones column last.
    cols = []
    for b_ in range(B):
        cols.append(x[b_])
        cols.append(jnp.zeros((T, HID - N_MEL), jnp.float32))
    cols.append(jnp.ones((T, 1), jnp.float32))
    return jnp.concatenate(cols, axis=-1)


@jax.jit
def mel_style_encoder(x, w_lin, w_conv):
    x_in = pack_x(x)                                  # layout plumbing only
    out = pl.pallas_call(
        mel_style_kernel,
        out_shape=jax.ShapeDtypeStruct((1, B * OUT), jnp.float32),
        in_specs=[pl.BlockSpec(memory_space=pltpu.MemorySpace.VMEM),
                  pl.BlockSpec(memory_space=pltpu.MemorySpace.VMEM),
                  pl.BlockSpec(memory_space=pltpu.MemorySpace.VMEM)],
        out_specs=pl.BlockSpec(memory_space=pltpu.MemorySpace.VMEM),
    )(x_in, w_lin, w_conv)
    return out.reshape(B, OUT)                        # (B, OUT)


# ---------------- pure-JAX reference (mirrors the PyTorch forward, eval, mask=None) ----------------
def _softplus(x):
    return jnp.maximum(x, 0.0) + jnp.log1p(jnp.exp(-jnp.abs(x)))


def _mish_ref(x):
    return x * jnp.tanh(_softplus(x))


def reference(x, params):
    (w1, b1, w2, b2,
     ca1, cba1, cg1, cbg1, ca2, cba2, cg2, cbg2,
     wq, bq, wk, bk, wv, bv, wo, bo, wf, bf) = params

    h = _mish_ref(x @ w1 + b1[0])
    h = _mish_ref(h @ w2 + b2[0])

    def conv_glu(h, ca, cba, cg, cbg):
        hp = jnp.pad(h, ((0, 0), (PAD, PAD), (0, 0)))
        a = jnp.broadcast_to(cba[0], h.shape) + sum(
            jnp.einsum('btc,cd->btd', hp[:, k:k + T], ca[k]) for k in range(K))
        g = jnp.broadcast_to(cbg[0], h.shape) + sum(
            jnp.einsum('btc,cd->btd', hp[:, k:k + T], cg[k]) for k in range(K))
        return h + a * _sigmoid(g)

    h = conv_glu(h, ca1, cba1, cg1, cbg1)
    h = conv_glu(h, ca2, cba2, cg2, cbg2)

    res = h
    att = jnp.zeros_like(h)
    for hd in range(NH):
        qs = h @ wq[hd] + bq[hd, 0]
        ks = h @ wk[hd] + bk[hd, 0]
        vs = h @ wv[hd] + bv[hd, 0]
        sc = jnp.einsum('btd,bsd->bts', qs, ks) / TEMP
        p = jax.nn.softmax(sc, axis=-1)
        att = att + jnp.einsum('bts,bsd->btd', p, vs) @ wo[hd]
    h = res + att + bo[0]

    y = h @ wf + bf[0]
    return jnp.mean(y, axis=1)


if __name__ == "__main__":
    key = jax.random.PRNGKey(0)
    kx, kp = jax.random.split(key)
    x = jax.random.normal(kx, (B, T, N_MEL), jnp.float32)
    params = init_params(kp)
    w_lin, w_conv = pack_params(params)

    out = mel_style_encoder(x, w_lin, w_conv)
    out = jax.block_until_ready(out)
    assert out.shape == (B, OUT)

    ref = reference(x, params)
    # tolerance dominated by the approx softmax reciprocal (~1e-4 rel); everything else is exact f32
    np.testing.assert_allclose(np.asarray(out), np.asarray(ref), rtol=5e-4, atol=5e-4)
    print("KERNEL_OK")
</pallas_src>

<mosaic_0001>
module attributes {stable_mosaic.version = 11 : i64} {
  func.func @mel_style_kernel(%arg0: memref<16x65xf32, #tpu.memory_space<vmem>>, %arg1: memref<65x448xf32, #tpu.memory_space<vmem>>, %arg2: memref<321x256xf32, #tpu.memory_space<vmem>>, %arg3: memref<1x64xf32, #tpu.memory_space<vmem>>) attributes {dimension_semantics = [], scalar_prefetch = 0 : i64, scratch_operands = 0 : i64, tpu.core_type = #tpu.core_type<tc>} {
    %cst = arith.constant 1.000000e+00 : f32
    %0 = vector.broadcast %cst : f32 to vector<16x1xf32>
    %cst_0 = arith.constant 0.000000e+00 : f32
    %1 = vector.broadcast %cst_0 : f32 to vector<2x64xf32>
    %c0 = arith.constant 0 : index
    %c0_1 = arith.constant 0 : index
    %2 = vector.load %arg0[%c0, %c0_1] : memref<16x65xf32, #tpu.memory_space<vmem>>, vector<16x65xf32>
    %c0_2 = arith.constant 0 : index
    %c0_3 = arith.constant 0 : index
    %3 = vector.load %arg1[%c0_2, %c0_3] : memref<65x448xf32, #tpu.memory_space<vmem>>, vector<65x64xf32>
    %cst_4 = arith.constant dense<0.000000e+00> : vector<16x64xf32>
    %4 = tpu.matmul %2, %3, %cst_4 {dimension_numbers = #tpu.dot_dimension_numbers<[1], [0], [0], [1], [0, 0, 1, 1], [], []>} : vector<16x65xf32>, vector<65x64xf32>, vector<16x64xf32> -> vector<16x64xf32>
    %5 = math.absf %4 : vector<16x64xf32>
    %cst_5 = arith.constant 0.000000e+00 : f32
    %6 = vector.broadcast %cst_5 : f32 to vector<16x64xf32>
    %7 = arith.subf %6, %5 : vector<16x64xf32>
    %8 = math.exp %7 : vector<16x64xf32>
    %cst_6 = arith.constant 1.000000e+00 : f32
    %9 = vector.broadcast %cst_6 : f32 to vector<16x64xf32>
    %10 = arith.addf %9, %8 : vector<16x64xf32>
    %cst_7 = arith.constant 1.000000e+00 : f32
    %11 = vector.broadcast %cst_7 : f32 to vector<16x64xf32>
    %12 = arith.addf %11, %8 : vector<16x64xf32>
    %13 = arith.mulf %10, %12 : vector<16x64xf32>
    %cst_8 = arith.constant 0.000000e+00 : f32
    %14 = vector.broadcast %cst_8 : f32 to vector<16x64xf32>
    %15 = arith.cmpf oge, %4, %14 : vector<16x64xf32>
    %16 = arith.mulf %8, %8 : vector<16x64xf32>
    %cst_9 = arith.constant 1.000000e+00 : f32
    %17 = vector.broadcast %cst_9 : f32 to vector<16x64xf32>
    %18 = arith.select %15, %16, %17 : vector<16x64xi1>, vector<16x64xf32>
    %19 = arith.subf %13, %18 : vector<16x64xf32>
    %20 = arith.mulf %4, %19 : vector<16x64xf32>
    %21 = arith.addf %13, %18 : vector<16x64xf32>
    %22 = arith.divf %20, %21 : vector<16x64xf32>
    %23 = tpu.concatenate %22, %0 in 1 : vector<16x64xf32>, vector<16x1xf32> -> vector<16x65xf32>
    %c0_10 = arith.constant 0 : index
    %c64 = arith.constant 64 : index
    %24 = vector.load %arg1[%c0_10, %c64] : memref<65x448xf32, #tpu.memory_space<vmem>>, vector<65x64xf32>
    %cst_11 = arith.constant dense<0.000000e+00> : vector<16x64xf32>
    %25 = tpu.matmul %23, %24, %cst_11 {dimension_numbers = #tpu.dot_dimension_numbers<[1], [0], [0], [1], [0, 0, 1, 1], [], []>} : vector<16x65xf32>, vector<65x64xf32>, vector<16x64xf32> -> vector<16x64xf32>
    %26 = math.absf %25 : vector<16x64xf32>
    %cst_12 = arith.constant 0.000000e+00 : f32
    %27 = vector.broadcast %cst_12 : f32 to vector<16x64xf32>
    %28 = arith.subf %27, %26 : vector<16x64xf32>
    %29 = math.exp %28 : vector<16x64xf32>
    %cst_13 = arith.constant 1.000000e+00 : f32
    %30 = vector.broadcast %cst_13 : f32 to vector<16x64xf32>
    %31 = arith.addf %30, %29 : vector<16x64xf32>
    %cst_14 = arith.constant 1.000000e+00 : f32
    %32 = vector.broadcast %cst_14 : f32 to vector<16x64xf32>
    %33 = arith.addf %32, %29 : vector<16x64xf32>
    %34 = arith.mulf %31, %33 : vector<16x64xf32>
    %cst_15 = arith.constant 0.000000e+00 : f32
    %35 = vector.broadcast %cst_15 : f32 to vector<16x64xf32>
    %36 = arith.cmpf oge, %25, %35 : vector<16x64xf32>
    %37 = arith.mulf %29, %29 : vector<16x64xf32>
    %cst_16 = arith.constant 1.000000e+00 : f32
    %38 = vector.broadcast %cst_16 : f32 to vector<16x64xf32>
    %39 = arith.select %36, %37, %38 : vector<16x64xi1>, vector<16x64xf32>
    %40 = arith.subf %34, %39 : vector<16x64xf32>
    %41 = arith.mulf %25, %40 : vector<16x64xf32>
    %42 = arith.addf %34, %39 : vector<16x64xf32>
    %43 = arith.divf %41, %42 : vector<16x64xf32>
    %c0_17 = arith.constant 0 : index
    %c0_18 = arith.constant 0 : index
    %44 = vector.load %arg2[%c0_17, %c0_18] : memref<321x256xf32, #tpu.memory_space<vmem>>, vector<321x128xf32>
    %45 = tpu.concatenate %1, %43, %1 in 0 : vector<2x64xf32>, vector<16x64xf32>, vector<2x64xf32> -> vector<20x64xf32>
    %46 = vector.extract_strided_slice %45 {offsets = [0, 0], sizes = [16, 64], strides = [1, 1]} : vector<20x64xf32> to vector<16x64xf32>
    %47 = vector.extract_strided_slice %45 {offsets = [1, 0], sizes = [16, 64], strides = [1, 1]} : vector<20x64xf32> to vector<16x64xf32>
    %48 = vector.extract_strided_slice %45 {offsets = [2, 0], sizes = [16, 64], strides = [1, 1]} : vector<20x64xf32> to vector<16x64xf32>
    %49 = vector.extract_strided_slice %45 {offsets = [3, 0], sizes = [16, 64], strides = [1, 1]} : vector<20x64xf32> to vector<16x64xf32>
    %50 = vector.extract_strided_slice %45 {offsets = [4, 0], sizes = [16, 64], strides = [1, 1]} : vector<20x64xf32> to vector<16x64xf32>
    %51 = tpu.concatenate %46, %47, %48, %49, %50, %0 in 1 : vector<16x64xf32>, vector<16x64xf32>, vector<16x64xf32>, vector<16x64xf32>, vector<16x64xf32>, vector<16x1xf32> -> vector<16x321xf32>
    %cst_19 = arith.constant dense<0.000000e+00> : vector<16x128xf32>
    %52 = tpu.matmul %51, %44, %cst_19 {dimension_numbers = #tpu.dot_dimension_numbers<[1], [0], [0], [1], [0, 0, 1, 1], [], []>} : vector<16x321xf32>, vector<321x128xf32>, vector<16x128xf32> -> vector<16x128xf32>
    %53 = vector.extract_strided_slice %52 {offsets = [0, 0], sizes = [16, 64], strides = [1, 1]} : vector<16x128xf32> to vector<16x64xf32>
    %54 = vector.extract_strided_slice %52 {offsets = [0, 64], sizes = [16, 64], strides = [1, 1]} : vector<16x128xf32> to vector<16x64xf32>
    %cst_20 = arith.constant 5.000000e-01 : f32
    %55 = vector.broadcast %cst_20 : f32 to vector<16x64xf32>
    %56 = arith.mulf %55, %54 : vector<16x64xf32>
    %57 = math.tanh %56 : vector<16x64xf32>
    %cst_21 = arith.constant 1.000000e+00 : f32
    %58 = vector.broadcast %cst_21 : f32 to vector<16x64xf32>
    %59 = arith.addf %57, %58 : vector<16x64xf32>
    %cst_22 = arith.constant 5.000000e-01 : f32
    %60 = vector.broadcast %cst_22 : f32 to vector<16x64xf32>
    %61 = arith.mulf %60, %59 : vector<16x64xf32>
    %62 = arith.mulf %53, %61 : vector<16x64xf32>
    %63 = arith.addf %43, %62 : vector<16x64xf32>
    %c0_23 = arith.constant 0 : index
    %c128 = arith.constant 128 : index
    %64 = vector.load %arg2[%c0_23, %c128] : memref<321x256xf32, #tpu.memory_space<vmem>>, vector<321x128xf32>
    %65 = tpu.concatenate %1, %63, %1 in 0 : vector<2x64xf32>, vector<16x64xf32>, vector<2x64xf32> -> vector<20x64xf32>
    %66 = vector.extract_strided_slice %65 {offsets = [0, 0], sizes = [16, 64], strides = [1, 1]} : vector<20x64xf32> to vector<16x64xf32>
    %67 = vector.extract_strided_slice %65 {offsets = [1, 0], sizes = [16, 64], strides = [1, 1]} : vector<20x64xf32> to vector<16x64xf32>
    %68 = vector.extract_strided_slice %65 {offsets = [2, 0], sizes = [16, 64], strides = [1, 1]} : vector<20x64xf32> to vector<16x64xf32>
    %69 = vector.extract_strided_slice %65 {offsets = [3, 0], sizes = [16, 64], strides = [1, 1]} : vector<20x64xf32> to vector<16x64xf32>
    %70 = vector.extract_strided_slice %65 {offsets = [4, 0], sizes = [16, 64], strides = [1, 1]} : vector<20x64xf32> to vector<16x64xf32>
    %71 = tpu.concatenate %66, %67, %68, %69, %70, %0 in 1 : vector<16x64xf32>, vector<16x64xf32>, vector<16x64xf32>, vector<16x64xf32>, vector<16x64xf32>, vector<16x1xf32> -> vector<16x321xf32>
    %cst_24 = arith.constant dense<0.000000e+00> : vector<16x128xf32>
    %72 = tpu.matmul %71, %64, %cst_24 {dimension_numbers = #tpu.dot_dimension_numbers<[1], [0], [0], [1], [0, 0, 1, 1], [], []>} : vector<16x321xf32>, vector<321x128xf32>, vector<16x128xf32> -> vector<16x128xf32>
    %73 = vector.extract_strided_slice %72 {offsets = [0, 0], sizes = [16, 64], strides = [1, 1]} : vector<16x128xf32> to vector<16x64xf32>
    %74 = vector.extract_strided_slice %72 {offsets = [0, 64], sizes = [16, 64], strides = [1, 1]} : vector<16x128xf32> to vector<16x64xf32>
    %cst_25 = arith.constant 5.000000e-01 : f32
    %75 = vector.broadcast %cst_25 : f32 to vector<16x64xf32>
    %76 = arith.mulf %75, %74 : vector<16x64xf32>
    %77 = math.tanh %76 : vector<16x64xf32>
    %cst_26 = arith.constant 1.000000e+00 : f32
    %78 = vector.broadcast %cst_26 : f32 to vector<16x64xf32>
    %79 = arith.addf %77, %78 : vector<16x64xf32>
    %cst_27 = arith.constant 5.000000e-01 : f32
    %80 = vector.broadcast %cst_27 : f32 to vector<16x64xf32>
    %81 = arith.mulf %80, %79 : vector<16x64xf32>
    %82 = arith.mulf %73, %81 : vector<16x64xf32>
    %83 = arith.addf %63, %82 : vector<16x64xf32>
    %84 = tpu.concatenate %83, %0 in 1 : vector<16x64xf32>, vector<16x1xf32> -> vector<16x65xf32>
    %c0_28 = arith.constant 0 : index
    %c128_29 = arith.constant 128 : index
    %85 = vector.load %arg1[%c0_28, %c128_29] : memref<65x448xf32, #tpu.memory_space<vmem>>, vector<65x192xf32>
    %cst_30 = arith.constant dense<0.000000e+00> : vector<16x192xf32>
    %86 = tpu.matmul %84, %85, %cst_30 {dimension_numbers = #tpu.dot_dimension_numbers<[1], [0], [0], [1], [0, 0, 1, 1], [], []>} : vector<16x65xf32>, vector<65x192xf32>, vector<16x192xf32> -> vector<16x192xf32>
    %87 = vector.extract_strided_slice %86 {offsets = [0, 0], sizes = [16, 16], strides = [1, 1]} : vector<16x192xf32> to vector<16x16xf32>
    %88 = vector.extract_strided_slice %86 {offsets = [0, 64], sizes = [16, 16], strides = [1, 1]} : vector<16x192xf32> to vector<16x16xf32>
    %89 = vector.extract_strided_slice %86 {offsets = [0, 128], sizes = [16, 16], strides = [1, 1]} : vector<16x192xf32> to vector<16x16xf32>
    %cst_31 = arith.constant dense<0.000000e+00> : vector<16x16xf32>
    %90 = tpu.matmul %87, %88, %cst_31 {dimension_numbers = #tpu.dot_dimension_numbers<[1], [1], [0], [0], [0, 0, 1, 0], [], []>} : vector<16x16xf32>, vector<16x16xf32>, vector<16x16xf32> -> vector<16x16xf32>
    %cst_32 = arith.constant 0.176776692 : f32
    %91 = vector.broadcast %cst_32 : f32 to vector<16x16xf32>
    %92 = arith.mulf %90, %91 : vector<16x16xf32>
    %cst_33 = arith.constant dense<0xFF800000> : vector<16xf32>
    %93 = vector.multi_reduction <maximumf>, %92, %cst_33 [1] : vector<16x16xf32> to vector<16xf32>
    %94 = vector.shape_cast %93 : vector<16xf32> to vector<16x1xf32>
    %95 = vector.broadcast %94 : vector<16x1xf32> to vector<16x16xf32>
    %96 = arith.subf %92, %95 : vector<16x16xf32>
    %97 = math.exp %96 : vector<16x16xf32>
    %cst_34 = arith.constant dense<0.000000e+00> : vector<16xf32>
    %98 = vector.multi_reduction <add>, %97, %cst_34 [1] : vector<16x16xf32> to vector<16xf32>
    %99 = vector.shape_cast %98 : vector<16xf32> to vector<16x1xf32>
    %100 = tpu.reciprocal %99 {approx = true} : vector<16x1xf32> -> vector<16x1xf32>
    %101 = vector.broadcast %100 : vector<16x1xf32> to vector<16x16xf32>
    %102 = arith.mulf %97, %101 : vector<16x16xf32>
    %cst_35 = arith.constant dense<0.000000e+00> : vector<16x16xf32>
    %103 = tpu.matmul %102, %89, %cst_35 {dimension_numbers = #tpu.dot_dimension_numbers<[1], [0], [0], [1], [0, 0, 1, 1], [], []>} : vector<16x16xf32>, vector<16x16xf32>, vector<16x16xf32> -> vector<16x16xf32>
    %104 = vector.extract_strided_slice %86 {offsets = [0, 16], sizes = [16, 16], strides = [1, 1]} : vector<16x192xf32> to vector<16x16xf32>
    %105 = vector.extract_strided_slice %86 {offsets = [0, 80], sizes = [16, 16], strides = [1, 1]} : vector<16x192xf32> to vector<16x16xf32>
    %106 = vector.extract_strided_slice %86 {offsets = [0, 144], sizes = [16, 16], strides = [1, 1]} : vector<16x192xf32> to vector<16x16xf32>
    %cst_36 = arith.constant dense<0.000000e+00> : vector<16x16xf32>
    %107 = tpu.matmul %104, %105, %cst_36 {dimension_numbers = #tpu.dot_dimension_numbers<[1], [1], [0], [0], [0, 0, 1, 0], [], []>} : vector<16x16xf32>, vector<16x16xf32>, vector<16x16xf32> -> vector<16x16xf32>
    %cst_37 = arith.constant 0.176776692 : f32
    %108 = vector.broadcast %cst_37 : f32 to vector<16x16xf32>
    %109 = arith.mulf %107, %108 : vector<16x16xf32>
    %cst_38 = arith.constant dense<0xFF800000> : vector<16xf32>
    %110 = vector.multi_reduction <maximumf>, %109, %cst_38 [1] : vector<16x16xf32> to vector<16xf32>
    %111 = vector.shape_cast %110 : vector<16xf32> to vector<16x1xf32>
    %112 = vector.broadcast %111 : vector<16x1xf32> to vector<16x16xf32>
    %113 = arith.subf %109, %112 : vector<16x16xf32>
    %114 = math.exp %113 : vector<16x16xf32>
    %cst_39 = arith.constant dense<0.000000e+00> : vector<16xf32>
    %115 = vector.multi_reduction <add>, %114, %cst_39 [1] : vector<16x16xf32> to vector<16xf32>
    %116 = vector.shape_cast %115 : vector<16xf32> to vector<16x1xf32>
    %117 = tpu.reciprocal %116 {approx = true} : vector<16x1xf32> -> vector<16x1xf32>
    %118 = vector.broadcast %117 : vector<16x1xf32> to vector<16x16xf32>
    %119 = arith.mulf %114, %118 : vector<16x16xf32>
    %cst_40 = arith.constant dense<0.000000e+00> : vector<16x16xf32>
    %120 = tpu.matmul %119, %106, %cst_40 {dimension_numbers = #tpu.dot_dimension_numbers<[1], [0], [0], [1], [0, 0, 1, 1], [], []>} : vector<16x16xf32>, vector<16x16xf32>, vector<16x16xf32> -> vector<16x16xf32>
    %121 = vector.extract_strided_slice %86 {offsets = [0, 32], sizes = [16, 16], strides = [1, 1]} : vector<16x192xf32> to vector<16x16xf32>
    %122 = vector.extract_strided_slice %86 {offsets = [0, 96], sizes = [16, 16], strides = [1, 1]} : vector<16x192xf32> to vector<16x16xf32>
    %123 = vector.extract_strided_slice %86 {offsets = [0, 160], sizes = [16, 16], strides = [1, 1]} : vector<16x192xf32> to vector<16x16xf32>
    %cst_41 = arith.constant dense<0.000000e+00> : vector<16x16xf32>
    %124 = tpu.matmul %121, %122, %cst_41 {dimension_numbers = #tpu.dot_dimension_numbers<[1], [1], [0], [0], [0, 0, 1, 0], [], []>} : vector<16x16xf32>, vector<16x16xf32>, vector<16x16xf32> -> vector<16x16xf32>
    %cst_42 = arith.constant 0.176776692 : f32
    %125 = vector.broadcast %cst_42 : f32 to vector<16x16xf32>
    %126 = arith.mulf %124, %125 : vector<16x16xf32>
    %cst_43 = arith.constant dense<0xFF800000> : vector<16xf32>
    %127 = vector.multi_reduction <maximumf>, %126, %cst_43 [1] : vector<16x16xf32> to vector<16xf32>
    %128 = vector.shape_cast %127 : vector<16xf32> to vector<16x1xf32>
    %129 = vector.broadcast %128 : vector<16x1xf32> to vector<16x16xf32>
    %130 = arith.subf %126, %129 : vector<16x16xf32>
    %131 = math.exp %130 : vector<16x16xf32>
    %cst_44 = arith.constant dense<0.000000e+00> : vector<16xf32>
    %132 = vector.multi_reduction <add>, %131, %cst_44 [1] : vector<16x16xf32> to vector<16xf32>
    %133 = vector.shape_cast %132 : vector<16xf32> to vector<16x1xf32>
    %134 = tpu.reciprocal %133 {approx = true} : vector<16x1xf32> -> vector<16x1xf32>
    %135 = vector.broadcast %134 : vector<16x1xf32> to vector<16x16xf32>
    %136 = arith.mulf %131, %135 : vector<16x16xf32>
    %cst_45 = arith.constant dense<0.000000e+00> : vector<16x16xf32>
    %137 = tpu.matmul %136, %123, %cst_45 {dimension_numbers = #tpu.dot_dimension_numbers<[1], [0], [0], [1], [0, 0, 1, 1], [], []>} : vector<16x16xf32>, vector<16x16xf32>, vector<16x16xf32> -> vector<16x16xf32>
    %138 = vector.extract_strided_slice %86 {offsets = [0, 48], sizes = [16, 16], strides = [1, 1]} : vector<16x192xf32> to vector<16x16xf32>
    %139 = vector.extract_strided_slice %86 {offsets = [0, 112], sizes = [16, 16], strides = [1, 1]} : vector<16x192xf32> to vector<16x16xf32>
    %140 = vector.extract_strided_slice %86 {offsets = [0, 176], sizes = [16, 16], strides = [1, 1]} : vector<16x192xf32> to vector<16x16xf32>
    %cst_46 = arith.constant dense<0.000000e+00> : vector<16x16xf32>
    %141 = tpu.matmul %138, %139, %cst_46 {dimension_numbers = #tpu.dot_dimension_numbers<[1], [1], [0], [0], [0, 0, 1, 0], [], []>} : vector<16x16xf32>, vector<16x16xf32>, vector<16x16xf32> -> vector<16x16xf32>
    %cst_47 = arith.constant 0.176776692 : f32
    %142 = vector.broadcast %cst_47 : f32 to vector<16x16xf32>
    %143 = arith.mulf %141, %142 : vector<16x16xf32>
    %cst_48 = arith.constant dense<0xFF800000> : vector<16xf32>
    %144 = vector.multi_reduction <maximumf>, %143, %cst_48 [1] : vector<16x16xf32> to vector<16xf32>
    %145 = vector.shape_cast %144 : vector<16xf32> to vector<16x1xf32>
    %146 = vector.broadcast %145 : vector<16x1xf32> to vector<16x16xf32>
    %147 = arith.subf %143, %146 : vector<16x16xf32>
    %148 = math.exp %147 : vector<16x16xf32>
    %cst_49 = arith.constant dense<0.000000e+00> : vector<16xf32>
    %149 = vector.multi_reduction <add>, %148, %cst_49 [1] : vector<16x16xf32> to vector<16xf32>
    %150 = vector.shape_cast %149 : vector<16xf32> to vector<16x1xf32>
    %151 = tpu.reciprocal %150 {approx = true} : vector<16x1xf32> -> vector<16x1xf32>
    %152 = vector.broadcast %151 : vector<16x1xf32> to vector<16x16xf32>
    %153 = arith.mulf %148, %152 : vector<16x16xf32>
    %cst_50 = arith.constant dense<0.000000e+00> : vector<16x16xf32>
    %154 = tpu.matmul %153, %140, %cst_50 {dimension_numbers = #tpu.dot_dimension_numbers<[1], [0], [0], [1], [0, 0, 1, 1], [], []>} : vector<16x16xf32>, vector<16x16xf32>, vector<16x16xf32> -> vector<16x16xf32>
    %155 = tpu.concatenate %103, %120, %137, %154, %0 in 1 : vector<16x16xf32>, vector<16x16xf32>, vector<16x16xf32>, vector<16x16xf32>, vector<16x1xf32> -> vector<16x65xf32>
    %c0_51 = arith.constant 0 : index
    %c320 = arith.constant 320 : index
    %156 = vector.load %arg1[%c0_51, %c320] : memref<65x448xf32, #tpu.memory_space<vmem>>, vector<65x64xf32>
    %cst_52 = arith.constant dense<0.000000e+00> : vector<16x64xf32>
    %157 = tpu.matmul %155, %156, %cst_52 {dimension_numbers = #tpu.dot_dimension_numbers<[1], [0], [0], [1], [0, 0, 1, 1], [], []>} : vector<16x65xf32>, vector<65x64xf32>, vector<16x64xf32> -> vector<16x64xf32>
    %158 = arith.addf %83, %157 : vector<16x64xf32>
    %cst_53 = arith.constant dense<0.000000e+00> : vector<64xf32>
    %159 = vector.multi_reduction <add>, %158, %cst_53 [0] : vector<16x64xf32> to vector<64xf32>
    %160 = vector.shape_cast %159 : vector<64xf32> to vector<1x64xf32>
    %cst_54 = arith.constant 1.600000e+01 : f32
    %161 = vector.broadcast %cst_54 : f32 to vector<1x64xf32>
    %162 = arith.divf %160, %161 : vector<1x64xf32>
    %cst_55 = arith.constant 1.000000e+00 : f32
    %163 = vector.broadcast %cst_55 : f32 to vector<1x1xf32>
    %164 = tpu.concatenate %162, %163 in 1 : vector<1x64xf32>, vector<1x1xf32> -> vector<1x65xf32>
    %c0_56 = arith.constant 0 : index
    %c384 = arith.constant 384 : index
    %165 = vector.load %arg1[%c0_56, %c384] : memref<65x448xf32, #tpu.memory_space<vmem>>, vector<65x64xf32>
    %cst_57 = arith.constant dense<0.000000e+00> : vector<1x64xf32>
    %166 = tpu.matmul %164, %165, %cst_57 {dimension_numbers = #tpu.dot_dimension_numbers<[1], [0], [0], [1], [0, 0, 1, 1], [], []>} : vector<1x65xf32>, vector<65x64xf32>, vector<1x64xf32> -> vector<1x64xf32>
    %c0_58 = arith.constant 0 : index
    %c0_59 = arith.constant 0 : index
    %167 = vector.load %arg3[%c0_58, %c0_59] : memref<1x64xf32, #tpu.memory_space<vmem>>, vector<1x64xf32>
    tpu.vector_store %arg3[%c0_58, %c0_59], %166 {strides = array<i32>} : memref<1x64xf32, #tpu.memory_space<vmem>>, vector<1x64xf32>,
    return
  }
}

</mosaic_0001>

<bundles_post_ra>
// kernel: mel_style_encoder.1
= control target key start
LH: loop header
LB: loop body
LE: loop exit
PB: predicated region body
PF: predicated region fallthrough
CT: control target
= control target key end

     0   :  { %8 = vsyncpa [#allocation3], 0  ;;  %s3189_s0 = inlined_call_operand.vmem [shape: f32[16,65], index: 0, kind: input, shape index: {}]   ;;  %s3190_s1 = inlined_call_operand.hbm [shape: f32[65,448], index: 1, kind: input, shape index: {}]   ;;  %s3191_s2 = inlined_call_operand.hbm [shape: f32[321,256], index: 2, kind: input, shape index: {}]   ;;  %s3192_s3 = inlined_call_operand.vmem [shape: f32[1,64], index: 3, kind: output, shape index: {}]  }
   0x1   :  { %9 = vsyncpa [#allocation5], 0  ;;  %s2863_s12 = smov [#allocation2]   ;;  %s2815_s16 = scalar_lea.hbm %s3190_s1, 4608 }
   0x2   :  { %s17_s13 = sshll.u32 %s2863_s12, 4  ;;  %p2816_p0 = scmp.ne.s32.totalorder %s3190_s1, %s2815_s16  ;;  %s18_s13 = int_to_ptr.vmem [resolvable:$true] %s17_s13 }
   0x3   :  { %p2819_p1 = scmp.lt.u32.totalorder %s2815_s16, %s3190_s1 }
   0x5   :  { %p2821_p2 = pnand %p2819_p1, %p2816_p0 }
   0x7   :  { %2824 = shalt.err (!%p2821_p2)
}
   0x8   :  { %s2825_s21 = scalar_lea.vmem %s18_s13, 4608  ;;  %p2830_p4 = scmp.lt.s32.totalorder %s18_s13, %s18_s13 }
   0x9   :  { %p2826_p3 = scmp.ne.s32.totalorder %s18_s13, %s2825_s21  ;;  %p2831_p5 = scmp.lt.s32.totalorder %s2825_s21, %s2825_s21 }
   0xb   :  { %p2832_p6 = por %p2831_p5, %p2830_p4 }
   0xd   :  { %p2833_p7 = pnand %p2832_p6, %p2826_p3 }
   0xf   :  { %2836 = shalt.err (!%p2833_p7)
}
  0x10   :  { %s2864_s22 = smov 512   ;;  %s2865_s23 = smov 32  }
  0x11   :  { %23 = dma.hbm_to_vmem [thread:$0]  %s3190_s1, 4608, %s18_s13, [#allocation3], %s2864_s22, %s2864_s22, %s2865_s23  }
  0x12   :  { %s2866_s26 = smov [#allocation4]   ;;  %s2837_s30 = scalar_lea.hbm %s3191_s2, 10496 }
  0x13   :  { %s29_s27 = sshll.u32 %s2866_s26, 4  ;;  %p2838_p8 = scmp.ne.s32.totalorder %s3191_s2, %s2837_s30  ;;  %s30_s27 = int_to_ptr.vmem [resolvable:$true] %s29_s27 }
  0x14   :  { %p2841_p9 = scmp.lt.u32.totalorder %s2837_s30, %s3191_s2 }
  0x16   :  { %p2843_p10 = pnand %p2841_p9, %p2838_p8 }
  0x18   :  { %2846 = shalt.err (!%p2843_p10)
}
  0x19   :  { %s2847_s8 = scalar_lea.vmem %s30_s27, 10496  ;;  %p2852_p12 = scmp.lt.s32.totalorder %s30_s27, %s30_s27 }
  0x1a   :  { %p2848_p11 = scmp.ne.s32.totalorder %s30_s27, %s2847_s8  ;;  %p2853_p13 = scmp.lt.s32.totalorder %s2847_s8, %s2847_s8 }
  0x1c   :  { %p2854_p0 = por %p2853_p13, %p2852_p12 }
  0x1e   :  { %p2855_p1 = pnand %p2854_p0, %p2848_p11 }
  0x20   :  { %2858 = shalt.err (!%p2855_p1)
}
  0x21   :  { %s2867_s1 = smov 256   ;;  %s2868_s9 = smov 16  }
  0x22   :  { %35 = dma.hbm_to_vmem [thread:$0]  %s3191_s2, 10496, %s30_s27, [#allocation5], %s2867_s1, %s2867_s1, %s2868_s9  }
  0x23   :  { %2859 = dma.done.wait [#allocation3], 4608  }
  0x24   :  { %2860 = vsyncadd [#allocation3], 4294962688 }
  0x25   :  { %2861 = dma.done.wait [#allocation5], 10496  }
  0x26   :  { %2862 = vsyncadd [#allocation5], 4294956800  ;;  %v44_v0 = vld [vmem:[#allocation2] sm:$0xff]  ;;  %vm53_vm0 = vcmask 531456   ;;  %s2869_s2 = smov 64   ;;  %vm60_vm1 = vcmask 1040384  }
  0x27   :  { %v45_v1 = vld [vmem:[#allocation2 + $0x20] sm:$0xff]  ;;  %v43_v18 = vld [vmem:[%s3189_s0 + $0x8] sm:$0xff]  ;;  %vm167_vm4 = vcmask 523264   ;;  %vm358_vm7 = vcmask 1041408   ;;  %vm401_vm8 = vcmask 1043456   ;;  %vm369_vm9 = vcmask 1046528  }
  0x28   :  { %v46_v2 = vld [vmem:[#allocation2 + $0x40] sm:$0xff]  ;;  %v2438_v3 = vpack.c.bf16 %v45_v1, %v44_v0  ;;  %v2664_v7 = vpack.i.bf16 %v45_v1, %v44_v0  ;;  %vm389_vm10 = vcmask 1044480   ;;  %vm381_vm11 = vcmask 1045504   ;;  %s2872_s16 = smov 112   ;;  %s2873_s17 = smov 96  }
  0x29   :  { %v47_v4 = vld [vmem:[#allocation2 + $0x60] sm:$0xff]  ;;  %vm983_vm12 = vcmask 130048   ;;  %s2874_s18 = smov 80   ;;  %vm1806_vm14 = vcmask 261120   ;;  %vm1809_vm15 = vcmask 392192  }
  0x2a   :  { %v48_v5 = vld [vmem:[#allocation2 + $0x80] sm:$0xff]  ;;  %v2442_v8 = vpack.c.bf16 %v47_v4, %v46_v2  ;;  %2439 = vmatprep.subr.bf16.mxu0 %v2438_v3  ;;  %2665 = vrot.lane.b32.xlu0 %v2664_v7, %s2869_s2  ;;  %v2669_v11 = vpack.i.bf16 %v47_v4, %v46_v2  ;;  %vm3065_vm13 = vmpackc.low %vm983_vm12, %vm983_vm12 }
  0x2b   :  { %v49_v6 = vld [vmem:[#allocation2 + $0xa0] sm:$0xff]  ;;  %2441 = vmatpush3.bf16.msra.mxu0 %v2438_v3  ;;  %v348_v3 = vld [vmem:[#allocation4 + $0x210] sm:$0xff] }
  0x2c   :  { %v2674_v9 = vpack.i.bf16 %v49_v6, %v48_v5  ;;  %v42_v10 = vld [vmem:[%s3189_s0] sm:$0xff]  ;;  %2443 = vmatprep.subr.bf16.mxu0 %v2442_v8  ;;  %v2446_v14 = vpack.c.bf16 %v49_v6, %v48_v5  ;;  %v350_v6 = vld [vmem:[#allocation4 + $0x230] sm:$0xff]  ;;  %s2871_s0 = smov 48  }
  0x2d   :  { %v50_v12 = vld [vmem:[#allocation2 + $0xc0] sm:$0xff]  ;;  %2274 = vmatprep.mubr.msk.f32.mxu0 %vm53_vm0, %v42_v10 }
  0x2e   :  { %v51_v13 = vld [vmem:[#allocation2 + $0xe0] sm:$0xff]  ;;  %2675 = vrot.lane.b32.xlu1 %v2674_v9, %s2869_s2  ;;  %2670 = vrot.lane.b32.xlu0 %v2669_v11, %s2869_s2  ;;  %v352_v9 = vld [vmem:[#allocation4 + $0x250] sm:$0xff] }
  0x2f   :  { %v2679_v15 = vpack.i.bf16 %v51_v13, %v50_v12  ;;  %2445 = vmatpush3.bf16.msra.mxu0 %v2442_v8  ;;  %v2450_v16 = vpack.c.bf16 %v51_v13, %v50_v12  ;;  %v52_v17 = vld [vmem:[#allocation2 + $0x100] sm:$0x1]  ;;  %v354_v12 = vld [vmem:[#allocation4 + $0x270] sm:$0xff] }
  0x30   :  { %2447 = vmatprep.subr.bf16.mxu0 %v2446_v14  ;;  %v347_v2 = vld [vmem:[#allocation4 + $0x200] sm:$0xff] }
  0x31   :  { %v2502_v4 = vpack.c.bf16 %v348_v3, %v347_v2  ;;  %v349_v5 = vld [vmem:[#allocation4 + $0x220] sm:$0xff] }
  0x32   :  { %2680 = vrot.lane.b32.xlu1 %v2679_v15, %s2869_s2  ;;  %194 = vrot.lane.b32.xlu0 %v52_v17, %s2869_s2  ;;  %v2506_v7 = vpack.c.bf16 %v350_v6, %v349_v5  ;;  %v351_v8 = vld [vmem:[#allocation4 + $0x240] sm:$0xff] }
  0x33   :  { %2449 = vmatpush3.bf16.msra.mxu0 %v2446_v14  ;;  %v2510_v10 = vpack.c.bf16 %v352_v9, %v351_v8  ;;  %v353_v11 = vld [vmem:[#allocation4 + $0x260] sm:$0xff] }
  0x34   :  { %2451 = vmatprep.subr.bf16.mxu0 %v2450_v16  ;;  %v2514_v13 = vpack.c.bf16 %v354_v12, %v353_v11  ;;  %v355_v14 = vld [vmem:[#allocation4 + $0x280] sm:$0x1] }
  0x35   :  { %v331_v15 = vld [vmem:[#allocation4 + $0x100] sm:$0xff] }
  0x37   :  { %2453 = vmatpush3.bf16.msra.mxu0 %v2450_v16  ;;  %v332_v16 = vld [vmem:[#allocation4 + $0x110] sm:$0xff] }
  0x38   :  { %2272 = vmatprep.subr.msk.mxu0 %vm60_vm1, %v52_v17 }
  0x3b   :  { %2273 = vmatpush3.msk.msra.mxu0 %vm60_vm1, %v52_v17  ;;  %v315_v17 = vld [vmem:[#allocation4] sm:$0xff] }
  0x3c   :  { %2275 = vmatmul.mubr.msk.f32.vlgmr.msra.gmra.mrb[0].mxu0 %vm53_vm0, %v43_v18  ;;  %v2470_v18 = vpack.c.bf16 %v332_v16, %v331_v15  ;;  %v345_v15 = vld [vmem:[#allocation4 + $0x1e0] sm:$0xff]  ;;  %v346_v16 = vld [vmem:[#allocation4 + $0x1f0] sm:$0xff] }
  0x3e   :  { %2471 = vmatprep.subr.bf16.mxu0 %v2470_v18  ;;  %v2498_v18 = vpack.c.bf16 %v346_v16, %v345_v15 }
  0x9c   :  { %v2666_v19 = vpop.permute.xlu0 %2665 }
  0x9d   :  { %v2668_v20 = vunpack.i.h.bf16 %v2666_v19  ;;  %v2667_v21 = vunpack.i.l.bf16 %v2666_v19  ;;  %v316_v19 = vld [vmem:[#allocation4 + $0x10] sm:$0xff] }
  0x9f   :  { %v2454_v22 = vpack.c.bf16 %v2668_v20, %v2667_v21  ;;  %v333_v20 = vld [vmem:[#allocation4 + $0x120] sm:$0xff]  ;;  %v334_v21 = vld [vmem:[#allocation4 + $0x130] sm:$0xff] }
  0xa0   :  { %v2671_v23 = vpop.permute.xlu0 %2670  ;;  %v2676_v27 = vpop.permute.xlu1 %2675 }
  0xa1   :  { %v2673_v24 = vunpack.i.h.bf16 %v2671_v23  ;;  %v2672_v25 = vunpack.i.l.bf16 %v2671_v23  ;;  %2455 = vmatprep.subr.bf16.mxu1 %v2454_v22  ;;  %v2678_v28 = vunpack.i.h.bf16 %v2676_v27  ;;  %v2677_v29 = vunpack.i.l.bf16 %v2676_v27  ;;  %v336_v27 = vld [vmem:[#allocation4 + $0x150] sm:$0xff] }
  0xa2   :  { %2457 = vmatpush3.bf16.msra.mxu1 %v2454_v22  ;;  %v2472_v22 = vpack.c.bf16 %v316_v19, %v315_v17  ;;  %v2474_v23 = vpack.c.bf16 %v334_v21, %v333_v20  ;;  %v329_v19 = vld [vmem:[#allocation4 + $0xe0] sm:$0xff]  ;;  %v330_v20 = vld [vmem:[#allocation4 + $0xf0] sm:$0xff] }
  0xa3   :  { %v2458_v26 = vpack.c.bf16 %v2673_v24, %v2672_v25  ;;  %v2462_v30 = vpack.c.bf16 %v2678_v28, %v2677_v29  ;;  %v317_v24 = vld [vmem:[#allocation4 + $0x20] sm:$0xff]  ;;  %v318_v25 = vld [vmem:[#allocation4 + $0x30] sm:$0xff] }
  0xa4   :  { %v2681_v31 = vpop.permute.xlu1 %2680  ;;  %v195_v35 = vpop.permute.xlu0 %194  ;;  %2473 = vmatpush3.bf16.msra.mxu0 %v2472_v22  ;;  %v2476_v28 = vpack.c.bf16 %v318_v25, %v317_v24 }
  0xa5   :  { %2459 = vmatprep.subr.bf16.mxu1 %v2458_v26  ;;  %v2683_v32 = vunpack.i.h.bf16 %v2681_v31  ;;  %v2682_v33 = vunpack.i.l.bf16 %v2681_v31  ;;  %2475 = vmatprep.subr.bf16.mxu0 %v2474_v23  ;;  %v320_v31 = vld [vmem:[#allocation4 + $0x50] sm:$0xff]  ;;  %v2500_v23 = vpack.c.bf16 %v330_v20, %v329_v19  ;;  %v630_v20 = vld [vmem:[#allocation4 + $0x248] sm:$0xff] }
  0xa6   :  { %2461 = vmatpush3.bf16.msra.mxu1 %v2458_v26  ;;  %v335_v26 = vld [vmem:[#allocation4 + $0x140] sm:$0xff] }
  0xa7   :  { %2463 = vmatprep.subr.bf16.mxu1 %v2462_v30  ;;  %v2466_v34 = vpack.c.bf16 %v2683_v32, %v2682_v33  ;;  %v2478_v29 = vpack.c.bf16 %v336_v27, %v335_v26  ;;  %v337_v32 = vld [vmem:[#allocation4 + $0x160] sm:$0xff]  ;;  %v338_v33 = vld [vmem:[#allocation4 + $0x170] sm:$0xff] }
  0xa8   :  { %2477 = vmatpush3.bf16.msra.mxu0 %v2476_v28 }
  0xa9   :  { %2479 = vmatprep.subr.bf16.mxu0 %v2478_v29 }
  0xaa   :  { %2465 = vmatpush3.bf16.msra.mxu1 %v2462_v30  ;;  %v319_v30 = vld [vmem:[#allocation4 + $0x40] sm:$0xff] }
  0xab   :  { %2467 = vmatprep.subr.bf16.mxu1 %v2466_v34 }
  0xae   :  { %2469 = vmatpush3.bf16.msra.mxu1 %v2466_v34  ;;  %v2480_v34 = vpack.c.bf16 %v320_v31, %v319_v30 }
  0xaf   :  { %2293 = vmatprep.subr.msk.mxu1 %vm60_vm1, %v195_v35 }
  0xb0   :  { %2481 = vmatpush3.bf16.msra.mxu0 %v2480_v34 }
  0xb2   :  { %2294 = vmatpush3.msk.msra.mxu1 %vm60_vm1, %v195_v35  ;;  %v2482_v35 = vpack.c.bf16 %v338_v33, %v337_v32 }
  0xb3   :  { %2503 = vmatprep.subr.bf16.mxu1 %v2502_v4 }
  0xb4   :  { %2483 = vmatprep.subr.bf16.mxu0 %v2482_v35 }
 0x10f   :  { %v2276_v36 = vpop.f32.mrb[0].mxu0 }
 0x110   :  { %v140_v37 = vand.u32 2147483647, %v2276_v36  ;;  %v130_v38 = vpop.f32.mrb[1].mxu0  ;;  %vm152_vm2 = vcmp.ge.f32.partialorder %v2276_v36, 0.0 }
 0x111   :  { %v139_v39 = vand.u32 2147483647, %v130_v38  ;;  %vm151_vm3 = vcmp.ge.f32.partialorder %v130_v38, 0.0 }
 0x112   :  { %v142_v40 = vsub.f32 0.0, %v140_v37  ;;  %v322_v37 = vld [vmem:[#allocation4 + $0x70] sm:$0xff] }
 0x113   :  { %v141_v41 = vsub.f32 0.0, %v139_v39  ;;  %v340_v39 = vld [vmem:[#allocation4 + $0x190] sm:$0xff] }
 0x114   :  { %v145_v42 = vmul.f32 1.442695, %v142_v40 }
 0x115   :  { %v143_v43 = vmul.f32 1.442695, %v141_v41 }
 0x116   :  { %2759 = vpow2.f32 %v145_v42  ;;  %v323_v42 = vld [vmem:[#allocation4 + $0x80] sm:$0xff] }
 0x117   :  { %2761 = vpow2.f32 %v143_v43  ;;  %v324_v43 = vld [vmem:[#allocation4 + $0x90] sm:$0xff] }
 0x120   :  { %v2760_v44 = vpop.eup %2759 }
 0x121   :  { %v2762_v45 = vpop.eup %2761  ;;  %v148_v46 = vadd.f32 1.0, %v2760_v44  ;;  %v154_v47 = vmul.f32 %v2760_v44, %v2760_v44  ;;  %v341_v44 = vld [vmem:[#allocation4 + $0x1a0] sm:$0xff] }
 0x122   :  { %v147_v48 = vadd.f32 1.0, %v2762_v45  ;;  %v153_v49 = vmul.f32 %v2762_v45, %v2762_v45  ;;  %v342_v45 = vld [vmem:[#allocation4 + $0x1b0] sm:$0xff] }
 0x123   :  { %v150_v50 = vmul.f32 %v148_v46, %v148_v46  ;;  %v156_v51 = vsel %vm152_vm2, %v154_v47, 1.0  ;;  %v2488_v46 = vpack.c.bf16 %v324_v43, %v323_v42  ;;  %v2490_v47 = vpack.c.bf16 %v342_v45, %v341_v44 }
 0x124   :  { %v149_v52 = vmul.f32 %v147_v48, %v147_v48  ;;  %v155_v53 = vsel %vm151_vm3, %v153_v49, 1.0  ;;  %v325_v48 = vld [vmem:[#allocation4 + $0xa0] sm:$0xff]  ;;  %v326_v49 = vld [vmem:[#allocation4 + $0xb0] sm:$0xff]  ;;  %vm2876_vm2 = vmmov 0  }
 0x125   :  { %v162_v54 = vadd.f32 %v156_v51, %v150_v50  ;;  %v158_v56 = vsub.f32 %v150_v50, %v156_v51  ;;  %v343_v50 = vld [vmem:[#allocation4 + $0x1c0] sm:$0xff]  ;;  %v344_v51 = vld [vmem:[#allocation4 + $0x1d0] sm:$0xff] }
 0x126   :  { %v161_v55 = vadd.f32 %v155_v53, %v149_v52  ;;  %v157_v57 = vsub.f32 %v149_v52, %v155_v53  ;;  %v2492_v52 = vpack.c.bf16 %v326_v49, %v325_v48  ;;  %v2494_v53 = vpack.c.bf16 %v344_v51, %v343_v50 }
 0x127   :  { %2763 = vrcp.f32 %v162_v54  ;;  %v160_v58 = vmul.f32 %v2276_v36, %v158_v56  ;;  %v321_v36 = vld [vmem:[#allocation4 + $0x60] sm:$0xff] }
 0x128   :  { %2765 = vrcp.f32 %v161_v55  ;;  %v159_v60 = vmul.f32 %v157_v57, %v130_v38  ;;  %v339_v38 = vld [vmem:[#allocation4 + $0x180] sm:$0xff]  ;;  %v2484_v40 = vpack.c.bf16 %v322_v37, %v321_v36  ;;  %v328_v55 = vld [vmem:[#allocation4 + $0xd0] sm:$0xff] }
 0x129   :  { %v2486_v41 = vpack.c.bf16 %v340_v39, %v339_v38  ;;  %v327_v54 = vld [vmem:[#allocation4 + $0xc0] sm:$0xff] }
 0x12a   :  { %2485 = vmatpush3.bf16.msra.mxu0 %v2484_v40  ;;  %v2496_v56 = vpack.c.bf16 %v328_v55, %v327_v54 }
 0x12b   :  { %2487 = vmatprep.subr.bf16.mxu0 %v2486_v41 }
 0x12e   :  { %2489 = vmatpush3.bf16.msra.mxu0 %v2488_v46 }
 0x12f   :  { %2491 = vmatprep.subr.bf16.mxu0 %v2490_v47 }
 0x131   :  { %v2764_v59 = vpop.eup %2763 }
 0x132   :  { %v2766_v61 = vpop.eup %2765  ;;  %v166_v62 = vmul.f32 %v2764_v59, %v160_v58  ;;  %2493 = vmatpush3.bf16.msra.mxu0 %v2492_v52 }
 0x133   :  { %v164_v63 = vmul.f32 %v2766_v61, %v159_v60  ;;  %2495 = vmatprep.subr.bf16.mxu0 %v2494_v53 }
 0x134   :  { %v169_v1 = vsel %vm167_vm4, %v166_v62, 1.0 }
 0x135   :  { %v168_v0 = vsel %vm167_vm4, %v164_v63, 1.0 }
 0x136   :  { %2295 = vmatprep.mubr.msk.f32.mxu1 %vm53_vm0, %v168_v0  ;;  %2497 = vmatpush3.bf16.msra.mxu0 %v2496_v56 }
 0x137   :  { %2296 = vmatmul.mubr.msk.f32.vlgmr.msra.gmra.mrb[0].mxu1 %vm53_vm0, %v169_v1  ;;  %2499 = vmatprep.subr.bf16.mxu0 %v2498_v18  ;;  %v629_v18 = vld [vmem:[#allocation4 + $0x238] sm:$0xff] }
 0x138   :  { %2505 = vmatpush3.bf16.msra.mxu1 %v2502_v4 }
 0x139   :  { %2507 = vmatprep.subr.bf16.mxu1 %v2506_v7 }
 0x13a   :  { %2501 = vmatpush3.bf16.msra.mxu0 %v2500_v23 }
 0x13c   :  { %2509 = vmatpush3.bf16.msra.mxu1 %v2506_v7 }
 0x13d   :  { %2511 = vmatprep.subr.bf16.mxu1 %v2510_v10 }
 0x140   :  { %2513 = vmatpush3.bf16.msra.mxu1 %v2510_v10 }
 0x141   :  { %2515 = vmatprep.subr.bf16.mxu1 %v2514_v13 }
 0x144   :  { %2517 = vmatpush3.bf16.msra.mxu1 %v2514_v13 }
 0x145   :  { %2314 = vmatprep.subr.msk.mxu1 %vm60_vm1, %v355_v14 }
 0x148   :  { %2315 = vmatpush3.msk.msra.mxu1 %vm60_vm1, %v355_v14 }
 0x20a   :  { %v2297_v57 = vpop.f32.mrb[0].mxu1 }
 0x20b   :  { %v288_v58 = vand.u32 2147483647, %v2297_v57  ;;  %v278_v59 = vpop.f32.mrb[1].mxu1  ;;  %vm300_vm5 = vcmp.ge.f32.partialorder %v2297_v57, 0.0 }
 0x20c   :  { %v287_v60 = vand.u32 2147483647, %v278_v59  ;;  %vm299_vm6 = vcmp.ge.f32.partialorder %v278_v59, 0.0 }
 0x20d   :  { %v290_v61 = vsub.f32 0.0, %v288_v58 }
 0x20e   :  { %v289_v62 = vsub.f32 0.0, %v287_v60 }
 0x20f   :  { %v293_v63 = vmul.f32 1.442695, %v290_v61 }
 0x210   :  { %v291_v0 = vmul.f32 1.442695, %v289_v62 }
 0x211   :  { %2767 = vpow2.f32 %v293_v63 }
 0x212   :  { %2769 = vpow2.f32 %v291_v0 }
 0x21b   :  { %v2768_v1 = vpop.eup %2767 }
 0x21c   :  { %v2770_v2 = vpop.eup %2769  ;;  %v296_v3 = vadd.f32 1.0, %v2768_v1  ;;  %v302_v4 = vmul.f32 %v2768_v1, %v2768_v1 }
 0x21d   :  { %v295_v5 = vadd.f32 1.0, %v2770_v2  ;;  %v301_v6 = vmul.f32 %v2770_v2, %v2770_v2 }
 0x21e   :  { %v298_v7 = vmul.f32 %v296_v3, %v296_v3  ;;  %v304_v8 = vsel %vm300_vm5, %v302_v4, 1.0  ;;  %v626_v4 = vld [vmem:[#allocation4 + $0x208] sm:$0xff] }
 0x21f   :  { %v297_v9 = vmul.f32 %v295_v5, %v295_v5  ;;  %v303_v10 = vsel %vm299_vm6, %v301_v6, 1.0  ;;  %v627_v5 = vld [vmem:[#allocation4 + $0x218] sm:$0xff] }
 0x220   :  { %v310_v11 = vadd.f32 %v304_v8, %v298_v7  ;;  %v306_v13 = vsub.f32 %v298_v7, %v304_v8  ;;  %v2550_v6 = vpack.c.bf16 %v627_v5, %v626_v4  ;;  %v604_v4 = vld [vmem:[#allocation4 + $0xa8] sm:$0xff]  ;;  %v605_v5 = vld [vmem:[#allocation4 + $0xb8] sm:$0xff] }
 0x221   :  { %v309_v12 = vadd.f32 %v303_v10, %v297_v9  ;;  %v305_v14 = vsub.f32 %v297_v9, %v303_v10 }
 0x222   :  { %2771 = vrcp.f32 %v310_v11  ;;  %v308_v17 = vmul.f32 %v2297_v57, %v306_v13  ;;  %2551 = vmatprep.subr.bf16.mxu0 %v2550_v6 }
 0x223   :  { %2773 = vrcp.f32 %v309_v12  ;;  %v307_v22 = vmul.f32 %v305_v14, %v278_v59 }
 0x22c   :  { %v2772_v21 = vpop.eup %2771 }
 0x22d   :  { %v2774_v24 = vpop.eup %2773  ;;  %v2946_v25 = vmul.f32 %v2772_v21, %v308_v17  ;;  %v628_v17 = vld [vmem:[#allocation4 + $0x228] sm:$0xff]  ;;  %v631_v21 = vld [vmem:[#allocation4 + $0x258] sm:$0xff] }
 0x22e   :  { %v2948_v26 = vmul.f32 %v2774_v24, %v307_v22  ;;  %v2554_v19 = vpack.c.bf16 %v629_v18, %v628_v17  ;;  %v2558_v22 = vpack.c.bf16 %v631_v21, %v630_v20  ;;  %v625_v20 = vld [vmem:[#allocation4 + $0x1f8] sm:$0xff] }
 0x22f   :  { %v360_v27 = vrot.slane %v2946_v25, 6 }
 0x230   :  { %v359_v28 = vrot.slane %v2948_v26, 6 }
 0x231   :  { %v366_v29 = vsel %vm358_vm7, %v360_v27, 0.0 }
 0x232   :  { %v361_v30 = vsel %vm358_vm7, %v359_v28, %v360_v27  ;;  %v365_v31 = vsel %vm358_vm7, 0.0, %v359_v28  ;;  %v405_v32 = vrot.slane %v366_v29, 4  ;;  %v373_v33 = vrot.slane %v366_v29, 1  ;;  %v632_v27 = vld [vmem:[#allocation4 + $0x268] sm:$0xff]  ;;  %v633_v28 = vld [vmem:[#allocation4 + $0x278] sm:$0xff] }
 0x233   :  { %v402_v34 = vrot.slane %v365_v31, 4  ;;  %v403_v35 = vrot.slane %v361_v30, 4  ;;  %v371_v36 = vrot.slane %v361_v30, 1  ;;  %v391_v37 = vrot.slane %v361_v30, 3 }
 0x234   :  { %v393_v38 = vrot.slane %v366_v29, 3  ;;  %v370_v39 = vrot.slane %v365_v31, 1  ;;  %v390_v40 = vrot.slane %v365_v31, 3  ;;  %v382_v51 = vrot.slane %v365_v31, 2 }
 0x235   :  { %v404_v41 = vsel %vm401_vm8, %v402_v34, %v403_v35  ;;  %v406_v42 = vsel %vm401_vm8, %v403_v35, %v405_v32  ;;  %v374_v43 = vsel %vm369_vm9, %v371_v36, %v373_v33  ;;  %v383_v52 = vrot.slane %v361_v30, 2  ;;  %v634_v32 = vld [vmem:[#allocation4 + $0x288] sm:$0x1] }
 0x236   :  { %v413_v44 = vsel %vm167_vm4, %v404_v41, 1.0  ;;  %v414_v45 = vsel %vm167_vm4, %v406_v42, 1.0  ;;  %v394_v46 = vsel %vm389_vm10, %v391_v37, %v393_v38  ;;  %v372_v47 = vsel %vm369_vm9, %v370_v39, %v371_v36  ;;  %v610_v35 = vld [vmem:[#allocation4 + $0x108] sm:$0xff]  ;;  %v611_v36 = vld [vmem:[#allocation4 + $0x118] sm:$0xff] }
 0x237   :  { %2316 = vmatprep.mubr.msk.f32.mxu1 %vm53_vm0, %v413_v44  ;;  %v2689_v48 = vpack.i.bf16 %v374_v43, %v394_v46  ;;  %v392_v49 = vsel %vm389_vm10, %v390_v40, %v391_v37  ;;  %v385_v55 = vrot.slane %v366_v29, 2  ;;  %v384_v59 = vsel %vm381_vm11, %v382_v51, %v383_v52  ;;  %v594_v37 = vld [vmem:[#allocation4 + $0x8] sm:$0xff]  ;;  %v595_v39 = vld [vmem:[#allocation4 + $0x18] sm:$0xff] }
 0x238   :  { %2317 = vmatmul.mubr.msk.f32.vlgmr.msra.gmra.mrb[2].mxu1 %vm53_vm0, %v414_v45  ;;  %v2684_v50 = vpack.i.bf16 %v372_v47, %v392_v49  ;;  %v2518_v38 = vpack.c.bf16 %v611_v36, %v610_v35  ;;  %v612_v40 = vld [vmem:[#allocation4 + $0x128] sm:$0xff]  ;;  %v613_v41 = vld [vmem:[#allocation4 + $0x138] sm:$0xff]  ;;  %v2520_v42 = vpack.c.bf16 %v595_v39, %v594_v37 }
 0x239   :  { %2690 = vrot.lane.b32.xlu0 %v2689_v48, %s2869_s2  ;;  %v386_v63 = vsel %vm381_vm11, %v383_v52, %v385_v55  ;;  %v2522_v43 = vpack.c.bf16 %v613_v41, %v612_v40  ;;  %v596_v44 = vld [vmem:[#allocation4 + $0x28] sm:$0xff]  ;;  %v597_v45 = vld [vmem:[#allocation4 + $0x38] sm:$0xff] }
 0x23a   :  { %2685 = vrot.lane.b32.xlu1 %v2684_v50, %s2869_s2  ;;  %v614_v46 = vld [vmem:[#allocation4 + $0x148] sm:$0xff]  ;;  %2519 = vmatprep.subr.bf16.mxu1 %v2518_v38  ;;  %v615_v47 = vld [vmem:[#allocation4 + $0x158] sm:$0xff]  ;;  %v2524_v48 = vpack.c.bf16 %v597_v45, %v596_v44 }
 0x23b   :  { %2521 = vmatpush3.bf16.msra.mxu1 %v2520_v42  ;;  %v2526_v49 = vpack.c.bf16 %v615_v47, %v614_v46  ;;  %v598_v50 = vld [vmem:[#allocation4 + $0x48] sm:$0xff]  ;;  %v599_v51 = vld [vmem:[#allocation4 + $0x58] sm:$0xff] }
 0x23c   :  { %2523 = vmatprep.subr.bf16.mxu1 %v2522_v43  ;;  %v616_v52 = vld [vmem:[#allocation4 + $0x168] sm:$0xff] }
 0x23f   :  { %2525 = vmatpush3.bf16.msra.mxu1 %v2524_v48 }
 0x240   :  { %2527 = vmatprep.subr.bf16.mxu1 %v2526_v49 }
 0x2ab   :  { %v2691_v53 = vpop.permute.xlu0 %2690 }
 0x2ac   :  { %v2686_v54 = vpop.permute.xlu1 %2685  ;;  %v2692_v56 = vunpack.i.l.bf16 %v2691_v53  ;;  %v2693_v62 = vunpack.i.h.bf16 %v2691_v53  ;;  %v617_v53 = vld [vmem:[#allocation4 + $0x178] sm:$0xff] }
 0x2ad   :  { %v2688_v57 = vunpack.i.h.bf16 %v2686_v54  ;;  %v2687_v58 = vunpack.i.l.bf16 %v2686_v54  ;;  %v2528_v54 = vpack.c.bf16 %v599_v51, %v598_v50  ;;  %v2530_v55 = vpack.c.bf16 %v617_v53, %v616_v52 }
 0x2ae   :  { %v412_v0 = vsel %vm167_vm4, %v386_v63, %v2692_v56  ;;  %v410_v1 = vsel %vm167_vm4, %v361_v30, %v2693_v62  ;;  %v2562_v30 = vpack.c.bf16 %v633_v28, %v632_v27  ;;  %v600_v56 = vld [vmem:[#allocation4 + $0x68] sm:$0xff]  ;;  %v603_v63 = vld [vmem:[#allocation4 + $0x98] sm:$0xff] }
 0x2af   :  { %v411_v60 = vsel %vm167_vm4, %v384_v59, %v2687_v58  ;;  %v409_v61 = vsel %vm167_vm4, %v365_v31, %v2688_v57  ;;  %v601_v57 = vld [vmem:[#allocation4 + $0x78] sm:$0xff]  ;;  %v618_v58 = vld [vmem:[#allocation4 + $0x188] sm:$0xff]  ;;  %2529 = vmatpush3.bf16.msra.mxu1 %v2528_v54 }
 0x2b0   :  { %488 = vmatprep.mubr.f32.mxu0 %v411_v60  ;;  %v619_v59 = vld [vmem:[#allocation4 + $0x198] sm:$0xff]  ;;  %v2532_v60 = vpack.c.bf16 %v601_v57, %v600_v56  ;;  %2531 = vmatprep.subr.bf16.mxu1 %v2530_v55  ;;  %v602_v62 = vld [vmem:[#allocation4 + $0x88] sm:$0xff] }
 0x2b1   :  { %489 = vmatmul.mubr.f32.vlgmr.msra.gmra.mrb[2].mxu0 %v409_v61  ;;  %v2534_v61 = vpack.c.bf16 %v619_v59, %v618_v58  ;;  %v609_v27 = vld [vmem:[#allocation4 + $0xf8] sm:$0xff] }
 0x2b2   :  { %493 = vmatprep.mubr.f32.mxu0 %v412_v0  ;;  %2553 = vmatpush3.bf16.msra.mxu0 %v2550_v6  ;;  %v620_v0 = vld [vmem:[#allocation4 + $0x1a8] sm:$0xff] }
 0x2b3   :  { %2555 = vmatprep.subr.bf16.mxu0 %v2554_v19  ;;  %2533 = vmatpush3.bf16.msra.mxu1 %v2532_v60  ;;  %v622_v6 = vld [vmem:[#allocation4 + $0x1c8] sm:$0xff] }
 0x2b4   :  { %2535 = vmatprep.subr.bf16.mxu1 %v2534_v61 }
 0x2b5   :  { %494 = vmatmul.mubr.f32.gmra.mrb[4].mxu0 %v410_v1  ;;  %v621_v1 = vld [vmem:[#allocation4 + $0x1b8] sm:$0xff] }
 0x2b6   :  { %2557 = vmatpush3.bf16.msra.mxu0 %v2554_v19  ;;  %v624_v19 = vld [vmem:[#allocation4 + $0x1e8] sm:$0xff] }
 0x2b7   :  { %2559 = vmatprep.subr.bf16.mxu0 %v2558_v22 }
 0x2ba   :  { %2561 = vmatpush3.bf16.msra.mxu0 %v2558_v22 }
 0x2bb   :  { %2563 = vmatprep.subr.bf16.mxu0 %v2562_v30 }
 0x2be   :  { %2565 = vmatpush3.bf16.msra.mxu0 %v2562_v30 }
 0x2bf   :  { %2335 = vmatprep.subr.msk.mxu0 %vm60_vm1, %v634_v32 }
 0x2c2   :  { %2336 = vmatpush3.msk.msra.mxu0 %vm60_vm1, %v634_v32 }
 0x30b   :  { %v2318_v2 = vpop.f32.mrb[2].mxu1 }
 0x30c   :  { %v565_v3 = vpop.f32.mrb[3].mxu1 }
 0x384   :  { %v2137_v7 = vpop.f32.mrb[2].mxu0 }
 0x385   :  { %v2138_v8 = vpop.f32.mrb[3].mxu0 }
 0x386   :  { %v2139_v9 = vadd.f32 %v2138_v8, %v2137_v7  ;;  %v623_v7 = vld [vmem:[#allocation4 + $0x1d8] sm:$0xff]  ;;  %v2540_v8 = vpack.c.bf16 %v605_v5, %v604_v4  ;;  %v870_v4 = vld [vmem:[#allocation2 + $0x8] sm:$0xff] }
 0x388   :  { %v2973_v10 = vadd.f32 %v2139_v9, %v565_v3  ;;  %v2140_v11 = vpop.f32.mrb[4].mxu0  ;;  %v2538_v3 = vpack.c.bf16 %v621_v1, %v620_v0  ;;  %v2542_v9 = vpack.c.bf16 %v623_v7, %v622_v6  ;;  %v872_v6 = vld [vmem:[#allocation2 + $0x28] sm:$0xff]  ;;  %v3020_v7 = vld [vmem:[#allocation2 + $0x50] sm:$0xff] }
 0x389   :  { %v2141_v12 = vpop.f32.mrb[5].mxu0 }
 0x38a   :  { %v574_v13 = vmul.f32 0.5, %v2973_v10  ;;  %v2142_v14 = vadd.f32 %v2141_v12, %v2140_v11  ;;  %v606_v11 = vld [vmem:[#allocation4 + $0xc8] sm:$0xff]  ;;  %v607_v12 = vld [vmem:[#allocation4 + $0xd8] sm:$0xff] }
 0x38c   :  { %2775 = vtanh.f32 %v574_v13  ;;  %v2976_v15 = vadd.f32 %v2318_v2, %v2142_v14  ;;  %v2536_v2 = vpack.c.bf16 %v603_v63, %v602_v62  ;;  %v2544_v13 = vpack.c.bf16 %v607_v12, %v606_v11  ;;  %v874_v12 = vld [vmem:[#allocation2 + $0x48] sm:$0xff] }
 0x38e   :  { %v575_v16 = vmul.f32 0.5, %v2976_v15  ;;  %2537 = vmatpush3.bf16.msra.mxu1 %v2536_v2  ;;  %v3014_v2 = vld [vmem:[#allocation2 + $0x10] sm:$0xff] }
 0x38f   :  { %2539 = vmatprep.subr.bf16.mxu1 %v2538_v3  ;;  %v3016_v3 = vld [vmem:[#allocation2 + $0x30] sm:$0xff] }
 0x390   :  { %2777 = vtanh.f32 %v575_v16  ;;  %v2566_v5 = vpack.c.bf16 %v3016_v3, %v3014_v2 }
 0x392   :  { %2541 = vmatpush3.bf16.msra.mxu1 %v2540_v8  ;;  %v3022_v8 = vld [vmem:[#allocation2 + $0x70] sm:$0xff]  ;;  %2567 = vmatprep.subr.bf16.mxu0 %v2566_v5 }
 0x393   :  { %2543 = vmatprep.subr.bf16.mxu1 %v2542_v9  ;;  %v2568_v9 = vpack.c.bf16 %v872_v6, %v870_v4  ;;  %v2570_v11 = vpack.c.bf16 %v3022_v8, %v3020_v7 }
 0x396   :  { %v2776_v23 = vpop.eup %2775  ;;  %2545 = vmatpush3.bf16.msra.mxu1 %v2544_v13  ;;  %v876_v13 = vld [vmem:[#allocation2 + $0x68] sm:$0xff] }
 0x397   :  { %v578_v24 = vadd.f32 1.0, %v2776_v23  ;;  %v2546_v23 = vpack.c.bf16 %v625_v20, %v624_v19  ;;  %v878_v20 = vld [vmem:[#allocation2 + $0x88] sm:$0xff] }
 0x399   :  { %v580_v29 = vmul.f32 0.5, %v578_v24  ;;  %v608_v24 = vld [vmem:[#allocation4 + $0xe8] sm:$0xff]  ;;  %2547 = vmatprep.subr.bf16.mxu1 %v2546_v23  ;;  %v3034_v23 = vld [vmem:[#allocation2 + $0xf0] sm:$0xff] }
 0x39a   :  { %v2778_v31 = vpop.eup %2777  ;;  %v2548_v28 = vpack.c.bf16 %v609_v27, %v608_v24 }
 0x39b   :  { %584 = vrot.lane.b32.xlu1 %v580_v29, %s2869_s2  ;;  %v579_v33 = vadd.f32 1.0, %v2778_v31 }
 0x39c   :  { %2549 = vmatpush3.bf16.msra.mxu1 %v2548_v28 }
 0x39d   :  { %v581_v34 = vmul.f32 0.5, %v579_v33 }
 0x39f   :  { %586 = vrot.lane.b32.xlu0 %v581_v34, %s2869_s2 }
 0x40d   :  { %v585_v14 = vpop.permute.xlu1 %584 }
 0x40e   :  { %v590_v16 = vmul.f32 %v585_v14, %v2973_v10  ;;  %v3026_v14 = vld [vmem:[#allocation2 + $0x90] sm:$0xff] }
 0x410   :  { %v2985_v17 = vadd.f32 %v590_v16, %v2948_v26  ;;  %v3028_v16 = vld [vmem:[#allocation2 + $0xb0] sm:$0xff] }
 0x411   :  { %v587_v18 = vpop.permute.xlu0 %586  ;;  %v2574_v19 = vpack.c.bf16 %v3028_v16, %v3026_v14 }
 0x412   :  { %v637_v21 = vrot.slane %v2985_v17, 6  ;;  %v591_v22 = vmul.f32 %v587_v18, %v2976_v15  ;;  %v2572_v18 = vpack.c.bf16 %v876_v13, %v874_v12 }
 0x414   :  { %v2990_v29 = vadd.f32 %v591_v22, %v2946_v25  ;;  %v643_v10 = vsel %vm358_vm7, 0.0, %v637_v21  ;;  %v3032_v22 = vld [vmem:[#allocation2 + $0xd0] sm:$0xff] }
 0x415   :  { %v676_v32 = vrot.slane %v643_v10, 4  ;;  %v647_v33 = vrot.slane %v643_v10, 1  ;;  %v665_v25 = vrot.slane %v643_v10, 3  ;;  %v658_v52 = vrot.slane %v643_v10, 2 }
 0x416   :  { %v638_v26 = vrot.slane %v2990_v29, 6  ;;  %v2578_v27 = vpack.c.bf16 %v3034_v23, %v3032_v22 }
 0x418   :  { %v639_v30 = vsel %vm358_vm7, %v637_v21, %v638_v26  ;;  %v644_v31 = vsel %vm358_vm7, %v638_v26, 0.0  ;;  %v880_v21 = vld [vmem:[#allocation2 + $0xa8] sm:$0xff] }
 0x419   :  { %v679_v15 = vrot.slane %v644_v31, 4  ;;  %v677_v34 = vrot.slane %v639_v30, 4  ;;  %v648_v35 = vrot.slane %v639_v30, 1  ;;  %v650_v36 = vrot.slane %v644_v31, 1 }
 0x41a   :  { %v666_v37 = vrot.slane %v639_v30, 3  ;;  %v668_v38 = vrot.slane %v644_v31, 3  ;;  %v659_v49 = vrot.slane %v639_v30, 2  ;;  %v661_v53 = vrot.slane %v644_v31, 2 }
 0x41b   :  { %v678_v39 = vsel %vm401_vm8, %v676_v32, %v677_v34  ;;  %v680_v40 = vsel %vm401_vm8, %v677_v34, %v679_v15  ;;  %v651_v41 = vsel %vm369_vm9, %v648_v35, %v650_v36  ;;  %v649_v42 = vsel %vm369_vm9, %v647_v33, %v648_v35  ;;  %v882_v35 = vld [vmem:[#allocation2 + $0xc8] sm:$0xff] }
 0x41c   :  { %v687_v43 = vsel %vm167_vm4, %v678_v39, 1.0  ;;  %v688_v44 = vsel %vm167_vm4, %v680_v40, 1.0  ;;  %v669_v45 = vsel %vm389_vm10, %v666_v37, %v668_v38  ;;  %v667_v46 = vsel %vm389_vm10, %v665_v25, %v666_v37  ;;  %v884_v36 = vld [vmem:[#allocation2 + $0xe8] sm:$0xff]  ;;  %v3038_v25 = vld [vmem:[#allocation2 + $0x110] sm:$0x1] }
 0x41d   :  { %2337 = vmatprep.mubr.msk.f32.mxu0 %vm53_vm0, %v687_v43  ;;  %v2699_v47 = vpack.i.bf16 %v651_v41, %v669_v45  ;;  %v2694_v48 = vpack.i.bf16 %v649_v42, %v667_v46  ;;  %v660_v57 = vsel %vm381_vm11, %v658_v52, %v659_v49  ;;  %v662_v61 = vsel %vm381_vm11, %v659_v49, %v661_v53  ;;  %v886_v39 = vld [vmem:[#allocation2 + $0x108] sm:$0x1] }
 0x41e   :  { %2338 = vmatmul.mubr.msk.f32.vlgmr.msra.gmra.mrb[6].mxu0 %vm53_vm0, %v688_v44  ;;  %v2576_v24 = vpack.c.bf16 %v880_v21, %v878_v20  ;;  %v2580_v38 = vpack.c.bf16 %v884_v36, %v882_v35  ;;  %v2870_v40 = vmov 0.0  }
 0x41f   :  { %2700 = vrot.lane.b32.xlu0 %v2699_v47, %s2869_s2  ;;  %2695 = vrot.lane.b32.xlu1 %v2694_v48, %s2869_s2 }
 0x420   :  { %2569 = vmatpush1.bf16.msra.mxu0 %v2568_v9  ;;  %964 = vmatprep.mubr.f32.mxu0 %v2870_v40 }
 0x421   :  { %2571 = vmatprep.subr.bf16.mxu0 %v2570_v11 }
 0x424   :  { %2573 = vmatpush1.bf16.msra.mxu0 %v2572_v18 }
 0x425   :  { %2575 = vmatprep.subr.bf16.mxu0 %v2574_v19 }
 0x428   :  { %2577 = vmatpush1.bf16.msra.mxu0 %v2576_v24 }
 0x429   :  { %2579 = vmatprep.subr.bf16.mxu0 %v2578_v27 }
 0x42c   :  { %2581 = vmatpush1.bf16.msra.mxu0 %v2580_v38 }
 0x42d   :  { %2050 = vmatprep.subr.msk.mxu0 %vm60_vm1, %v3038_v25 }
 0x430   :  { %2051 = vmatpush1.msk.msra.mxu0 %vm60_vm1, %v886_v39 }
 0x491   :  { %v2701_v50 = vpop.permute.xlu0 %2700  ;;  %v2696_v51 = vpop.permute.xlu1 %2695 }
 0x492   :  { %v2702_v54 = vunpack.i.l.bf16 %v2701_v50  ;;  %v2698_v55 = vunpack.i.h.bf16 %v2696_v51  ;;  %v2697_v56 = vunpack.i.l.bf16 %v2696_v51  ;;  %v2703_v60 = vunpack.i.h.bf16 %v2701_v50 }
 0x494   :  { %v685_v58 = vsel %vm167_vm4, %v660_v57, %v2697_v56  ;;  %v683_v59 = vsel %vm167_vm4, %v643_v10, %v2698_v55  ;;  %v686_v62 = vsel %vm167_vm4, %v662_v61, %v2702_v54  ;;  %v684_v63 = vsel %vm167_vm4, %v639_v30, %v2703_v60 }
 0x495   :  { %762 = vmatprep.mubr.f32.mxu1 %v685_v58 }
 0x496   :  { %763 = vmatmul.mubr.f32.vlgmr.msra.gmra.mrb[4].mxu1 %v683_v59 }
 0x497   :  { %767 = vmatprep.mubr.f32.mxu1 %v686_v62 }
 0x49a   :  { %768 = vmatmul.mubr.f32.gmra.mrb[6].mxu1 %v684_v63 }
 0x4f1   :  { %v2339_v0 = vpop.f32.mrb[6].mxu0 }
 0x4f2   :  { %v839_v1 = vpop.f32.mrb[7].mxu0 }
 0x569   :  { %v2186_v28 = vpop.f32.mrb[4].mxu1 }
 0x56a   :  { %v2187_v10 = vpop.f32.mrb[5].mxu1 }
 0x56b   :  { %v2188_v26 = vadd.f32 %v2187_v10, %v2186_v28 }
 0x56d   :  { %v840_v30 = vadd.f32 %v2188_v26, %v839_v1  ;;  %v2189_v31 = vpop.f32.mrb[6].mxu1 }
 0x56e   :  { %v2190_v32 = vpop.f32.mrb[7].mxu1 }
 0x56f   :  { %v848_v33 = vmul.f32 0.5, %v840_v30  ;;  %v2191_v15 = vadd.f32 %v2190_v32, %v2189_v31 }
 0x571   :  { %2779 = vtanh.f32 %v848_v33  ;;  %v845_v34 = vadd.f32 %v2339_v0, %v2191_v15 }
 0x573   :  { %v849_v37 = vmul.f32 0.5, %v845_v34 }
 0x575   :  { %2781 = vtanh.f32 %v849_v37 }
 0x57b   :  { %v2780_v41 = vpop.eup %2779 }
 0x57c   :  { %v852_v42 = vadd.f32 1.0, %v2780_v41 }
 0x57e   :  { %v854_v43 = vmul.f32 0.5, %v852_v42 }
 0x57f   :  { %v2782_v44 = vpop.eup %2781 }
 0x580   :  { %858 = vrot.lane.b32.xlu1 %v854_v43, %s2869_s2  ;;  %v853_v45 = vadd.f32 1.0, %v2782_v44 }
 0x582   :  { %v855_v46 = vmul.f32 0.5, %v853_v45 }
 0x584   :  { %860 = vrot.lane.b32.xlu0 %v855_v46, %s2869_s2 }
 0x5f2   :  { %v859_v47 = vpop.permute.xlu1 %858 }
 0x5f3   :  { %v864_v48 = vmul.f32 %v859_v47, %v840_v30 }
 0x5f5   :  { %v3047_v49 = vadd.f32 %v864_v48, %v2985_v17 }
 0x5f6   :  { %v861_v50 = vpop.permute.xlu0 %860 }
 0x5f7   :  { %v868_v51 = vsel %vm167_vm4, %v3047_v49, 1.0  ;;  %v865_v52 = vmul.f32 %v861_v50, %v845_v34 }
 0x5f8   :  { %2052 = vmatmul.mubr.msk.f32.vlgmr.msra.gmra.mrb[8].mxu0 %vm53_vm0, %v868_v51 }
 0x5f9   :  { %v3053_v53 = vadd.f32 %v865_v52, %v2990_v29  ;;  %970 = vmatprep.mubr.f32.mxu0 %v2870_v40 }
 0x5fb   :  { %v869_v54 = vsel %vm167_vm4, %v3053_v53, 1.0 }
 0x5fc   :  { %2053 = vmatmul.mubr.msk.f32.gmra.mrb[10].mxu0 %vm53_vm0, %v869_v54 }
 0x6cb   :  { %v966_v17 = vpop.f32.mrb[8].mxu0 }
 0x6cc   :  { %v968_v55 = vpop.f32.mrb[9].mxu0  ;;  %2344 = vmatprep.mubr.msk.f32.mxu1 %vm983_vm12, %v966_v17 }
 0x6cf   :  { %v972_v56 = vpop.f32.mrb[10].mxu0 }
 0x6d0   :  { %v974_v57 = vpop.f32.mrb[11].mxu0  ;;  %v2704_v58 = vpack.i.bf16 %v972_v56, %v966_v17 }
 0x6d1   :  { %v2588_v59 = vpack.c.bf16 %v974_v57, %v968_v55  ;;  %v3060_v60 = vpack.i.bf16 %v974_v57, %v968_v55 }
 0x6d2   :  { %2705 = vrot.lane.b32.xlu1 %v2704_v58, %s2869_s2 }
 0x744   :  { %v2706_v29 = vpop.permute.xlu1 %2705 }
 0x745   :  { %v2708_v61 = vunpack.i.h.bf16 %v2706_v29  ;;  %v2707_v62 = vunpack.i.l.bf16 %v2706_v29 }
 0x747   :  { %v2582_v0 = vpack.c.bf16 %v2708_v61, %v2707_v62 }
 0x749   :  { %2584 = vmatprep.subr.msk.bf16.mxu1 %vm3065_vm13, %v2582_v0 }
 0x74a   :  { %2587 = vmatpush3.bf16.xpose.msk.msra.mxu1 %vm3065_vm13, %v2582_v0 }
 0x74b   :  { %2589 = vmatprep.subr.bf16.mxu1 %v2588_v59 }
 0x751   :  { %2345 = vmatmul.mubr.msk.f32.vlgmr.msra.gmra.mrb[8].mxu1 %vm983_vm12, %v972_v56 }
 0x752   :  { %2591 = vmatpush3.bf16.msra.mxu1 %v2588_v59 }
 0x824   :  { %v2346_v1 = vpop.f32.mrb[8].mxu1 }
 0x825   :  { %v1068_v4 = vmul.f32 0.17677669, %v2346_v1  ;;  %v1058_v5 = vpop.f32.mrb[9].mxu1 }
 0x826   :  { %v1067_v6 = vmul.f32 0.17677669, %v1058_v5 }
 0x827   :  { %v1072_v9 = vsel %vm983_vm12, %v1068_v4, -inf }
 0x828   :  { %1073 = vmax.xlane.f32.xlu1 %v1072_v9  ;;  %v1069_v11 = vsel %vm983_vm12, %v1067_v6, -inf }
 0x829   :  { %1070 = vmax.xlane.f32.xlu0 %v1069_v11 }
 0x839   :  { %2710 = vrot.lane.b32.xlu1 %v2704_v58, %s2871_s0 }
 0x83d   :  { %2720 = vrot.lane.b32.xlu1 %v2704_v58, %s2868_s9 }
 0x841   :  { %1172 = vrot.lane.b32.xlu1 %v966_v17, %s2872_s16 }
 0x845   :  { %1376 = vrot.lane.b32.xlu1 %v966_v17, %s2873_s17 }
 0x849   :  { %1578 = vrot.lane.b32.xlu1 %v966_v17, %s2874_s18 }
 0x8b5   :  { %v1074_v12 = vpop.xlane.xlu1 %1073 }
 0x8b6   :  { %v1076_v13 = vsub.f32 %v1068_v4, %v1074_v12  ;;  %v1071_v18 = vpop.xlane.xlu0 %1070 }
 0x8b7   :  { %v1075_v19 = vsub.f32 %v1067_v6, %v1071_v18 }
 0x8b8   :  { %v1079_v20 = vmul.f32 1.442695, %v1076_v13 }
 0x8b9   :  { %v1077_v21 = vmul.f32 1.442695, %v1075_v19  ;;  %v2711_v24 = vpop.permute.xlu1 %2710 }
 0x8ba   :  { %2783 = vpow2.f32 %v1079_v20  ;;  %v2713_v27 = vunpack.i.h.bf16 %v2711_v24  ;;  %v2712_v28 = vunpack.i.l.bf16 %v2711_v24 }
 0x8bb   :  { %2785 = vpow2.f32 %v1077_v21 }
 0x8bc   :  { %v2592_v10 = vpack.c.bf16 %v2713_v27, %v2712_v28 }
 0x8bd   :  { %v2721_v26 = vpop.permute.xlu1 %2720 }
 0x8be   :  { %2594 = vmatprep.subr.msk.bf16.mxu1 %vm3065_vm13, %v2592_v10  ;;  %v2723_v38 = vunpack.i.h.bf16 %v2721_v26  ;;  %v2722_v39 = vunpack.i.l.bf16 %v2721_v26 }
 0x8c0   :  { %v2612_v44 = vpack.c.bf16 %v2723_v38, %v2722_v39 }
 0x8c1   :  { %v1173_v30 = vpop.permute.xlu1 %1172 }
 0x8c4   :  { %v2784_v31 = vpop.eup %2783 }
 0x8c5   :  { %v1377_v32 = vpop.permute.xlu1 %1376  ;;  %v1084_v33 = vsel %vm983_vm12, %v2784_v31, 0.0  ;;  %v2786_v15 = vpop.eup %2785 }
 0x8c6   :  { %2372 = vmatprep.mubr.msk.f32.mxu0 %vm983_vm12, %v1377_v32  ;;  %1085 = vadd.xlane.f32.xlu0 %v1084_v33  ;;  %v1081_v34 = vsel %vm983_vm12, %v2786_v15, 0.0 }
 0x8c9   :  { %v1579_v52 = vpop.permute.xlu1 %1578 }
 0x8ca   :  { %1082 = vadd.xlane.f32.xlu0 %v1081_v34 }
 0x8e0   :  { %2715 = vrot.lane.b32.xlu0 %v2704_v58, %s2865_s23 }
 0x8e4   :  { %1174 = vrot.lane.b32.xlu0 %v972_v56, %s2872_s16 }
 0x8e8   :  { %1378 = vrot.lane.b32.xlu0 %v972_v56, %s2873_s17 }
 0x8ec   :  { %1580 = vrot.lane.b32.xlu0 %v972_v56, %s2874_s18 }
 0x953   :  { %v1086_v35 = vpop.xlane.xlu0 %1085 }
 0x954   :  { %2787 = vrcp.f32 %v1086_v35 }
 0x957   :  { %v1083_v36 = vpop.xlane.xlu0 %1082 }
 0x958   :  { %2789 = vrcp.f32 %v1083_v36 }
 0x95b   :  { %v2716_v37 = vpop.permute.xlu0 %2715 }
 0x95c   :  { %v2718_v41 = vunpack.i.h.bf16 %v2716_v37  ;;  %v2717_v42 = vunpack.i.l.bf16 %v2716_v37 }
 0x95e   :  { %v2602_v43 = vpack.c.bf16 %v2718_v41, %v2717_v42  ;;  %v2788_v45 = vpop.eup %2787 }
 0x95f   :  { %v1175_v46 = vpop.permute.xlu0 %1174  ;;  %v1090_v50 = vmul.f32 %v2788_v45, %v2784_v31 }
 0x960   :  { %2604 = vmatprep.subr.msk.bf16.mxu0 %vm3065_vm13, %v2602_v43 }
 0x961   :  { %2607 = vmatpush3.bf16.xpose.msk.msra.mxu0 %vm3065_vm13, %v2602_v43 }
 0x962   :  { %v2790_v47 = vpop.eup %2789  ;;  %2614 = vmatprep.subr.msk.bf16.mxu0 %vm3065_vm13, %v2612_v44 }
 0x963   :  { %v1089_v48 = vmul.f32 %v2790_v47, %v2786_v15  ;;  %v1379_v51 = vpop.permute.xlu0 %1378 }
 0x965   :  { %2351 = vmatprep.mubr.msk.f32.mxu1 %vm983_vm12, %v1089_v48 }
 0x966   :  { %2352 = vmatmul.mubr.msk.f32.vlgmr.msra.gmra.mrb[10].mxu1 %vm983_vm12, %v1090_v50 }
 0x967   :  { %2597 = vmatpush3.bf16.xpose.msk.msra.mxu1 %vm3065_vm13, %v2592_v10  ;;  %2358 = vmatprep.mubr.msk.f32.mxu1 %vm983_vm12, %v1173_v30  ;;  %v1581_v54 = vpop.permute.xlu0 %1580 }
 0x968   :  { %2373 = vmatmul.mubr.msk.f32.vlgmr.msra.gmra.mrb[12].mxu0 %vm983_vm12, %v1379_v51 }
 0x969   :  { %2617 = vmatpush3.bf16.xpose.msk.msra.mxu0 %vm3065_vm13, %v2612_v44  ;;  %2386 = vmatprep.mubr.msk.f32.mxu0 %vm983_vm12, %v1579_v52 }
 0x96e   :  { %2359 = vmatmul.mubr.msk.f32.vlgmr.msra.gmra.mrb[12].mxu1 %vm983_vm12, %v1175_v46 }
 0x970   :  { %2387 = vmatmul.mubr.msk.f32.vlgmr.msra.gmra.mrb[14].mxu0 %vm983_vm12, %v1581_v54  ;;  %v2739_v54 = vpack.i.bf16 %v3016_v3, %v3014_v2 }
 0x971   :  { %2435 = vmatprep.mubr.msk.f32.mxu0 %vm2876_vm2, %v2870_v40 }
 0xa39   :  { %v3107_v17 = vpop.f32.mrb[10].mxu1 }
 0xa3a   :  { %v3109_v55 = vpop.f32.mrb[11].mxu1 }
 0xa3b   :  { %v2374_v56 = vpop.f32.mrb[12].mxu0 }
 0xa3c   :  { %v1458_v57 = vpop.f32.mrb[13].mxu0  ;;  %v1468_v4 = vmul.f32 0.17677669, %v2374_v56  ;;  %v2744_v56 = vpack.i.bf16 %v3022_v8, %v3020_v7 }
 0xa3d   :  { %v1467_v63 = vmul.f32 0.17677669, %v1458_v57  ;;  %v2754_v57 = vpack.i.bf16 %v3034_v23, %v3032_v22 }
 0xa3e   :  { %v1472_v12 = vsel %vm983_vm12, %v1468_v4, -inf }
 0xa3f   :  { %v1469_v9 = vsel %vm983_vm12, %v1467_v63, -inf }
 0xa41   :  { %v2360_v58 = vpop.f32.mrb[12].mxu1 }
 0xa42   :  { %v1264_v59 = vmul.f32 0.17677669, %v2360_v58  ;;  %v1254_v29 = vpop.f32.mrb[13].mxu1  ;;  %v2749_v58 = vpack.i.bf16 %v3028_v16, %v3026_v14 }
 0xa43   :  { %v1263_v61 = vmul.f32 0.17677669, %v1254_v29  ;;  %v2388_v62 = vpop.f32.mrb[14].mxu0 }
 0xa44   :  { %v1660_v0 = vpop.f32.mrb[15].mxu0  ;;  %v1268_v1 = vsel %vm983_vm12, %v1264_v59, -inf  ;;  %v1670_v11 = vmul.f32 0.17677669, %v2388_v62 }
 0xa45   :  { %1269 = vmax.xlane.f32.xlu0 %v1268_v1  ;;  %v1265_v5 = vsel %vm983_vm12, %v1263_v61, -inf  ;;  %v1669_v6 = vmul.f32 0.17677669, %v1660_v0 }
 0xa46   :  { %1266 = vmax.xlane.f32.xlu1 %v1265_v5  ;;  %v1674_v18 = vsel %vm983_vm12, %v1670_v11, -inf }
 0xa47   :  { %v1671_v13 = vsel %vm983_vm12, %v1669_v6, -inf }
 0xa49   :  { %1470 = vmax.xlane.f32.xlu0 %v1469_v9 }
 0xa4a   :  { %1473 = vmax.xlane.f32.xlu1 %v1472_v12 }
 0xa4d   :  { %1672 = vmax.xlane.f32.xlu0 %v1671_v13 }
 0xa4e   :  { %1675 = vmax.xlane.f32.xlu1 %v1674_v18 }
 0xad2   :  { %v1270_v19 = vpop.xlane.xlu0 %1269 }
 0xad3   :  { %v1267_v20 = vpop.xlane.xlu1 %1266  ;;  %v1272_v30 = vsub.f32 %v1264_v59, %v1270_v19 }
 0xad4   :  { %v1271_v10 = vsub.f32 %v1263_v61, %v1267_v20 }
 0xad5   :  { %v1275_v37 = vmul.f32 1.442695, %v1272_v30 }
 0xad6   :  { %v1471_v21 = vpop.xlane.xlu0 %1470  ;;  %v1273_v35 = vmul.f32 1.442695, %v1271_v10 }
 0xad7   :  { %v1475_v24 = vsub.f32 %v1467_v63, %v1471_v21  ;;  %v1474_v27 = vpop.xlane.xlu1 %1473 }
 0xad8   :  { %v1476_v28 = vsub.f32 %v1468_v4, %v1474_v27 }
 0xad9   :  { %v1477_v26 = vmul.f32 1.442695, %v1475_v24 }
 0xada   :  { %v1479_v31 = vmul.f32 1.442695, %v1476_v28  ;;  %v1673_v32 = vpop.xlane.xlu0 %1672 }
 0xadb   :  { %2791 = vpow2.f32 %v1477_v26  ;;  %v1677_v33 = vsub.f32 %v1669_v6, %v1673_v32  ;;  %v1676_v15 = vpop.xlane.xlu1 %1675 }
 0xadc   :  { %2793 = vpow2.f32 %v1479_v31  ;;  %v1678_v34 = vsub.f32 %v1670_v11, %v1676_v15 }
 0xadd   :  { %v1679_v36 = vmul.f32 1.442695, %v1677_v33 }
 0xade   :  { %v1681_v38 = vmul.f32 1.442695, %v1678_v34 }
 0xadf   :  { %2795 = vpow2.f32 %v1679_v36 }
 0xae0   :  { %2797 = vpow2.f32 %v1681_v38 }
 0xae1   :  { %2799 = vpow2.f32 %v1273_v35 }
 0xae2   :  { %2801 = vpow2.f32 %v1275_v37 }
 0xae5   :  { %v2792_v39 = vpop.eup %2791 }
 0xae6   :  { %v3117_v41 = vpop.eup %2793  ;;  %v1481_v42 = vsel %vm983_vm12, %v2792_v39, 0.0 }
 0xae7   :  { %1482 = vadd.xlane.f32.xlu0 %v1481_v42  ;;  %v1484_v43 = vsel %vm983_vm12, %v3117_v41, 0.0 }
 0xae8   :  { %1485 = vadd.xlane.f32.xlu1 %v1484_v43 }
 0xae9   :  { %v3122_v44 = vpop.eup %2795 }
 0xaea   :  { %v3124_v45 = vpop.eup %2797  ;;  %v1683_v46 = vsel %vm983_vm12, %v3122_v44, 0.0 }
 0xaeb   :  { %v2800_v47 = vpop.eup %2799  ;;  %1684 = vadd.xlane.f32.xlu0 %v1683_v46  ;;  %v1686_v48 = vsel %vm983_vm12, %v3124_v45, 0.0 }
 0xaec   :  { %v2802_v50 = vpop.eup %2801  ;;  %1687 = vadd.xlane.f32.xlu1 %v1686_v48  ;;  %v1277_v51 = vsel %vm983_vm12, %v2800_v47, 0.0 }
 0xaed   :  { %v1280_v52 = vsel %vm983_vm12, %v2802_v50, 0.0 }
 0xaef   :  { %1278 = vadd.xlane.f32.xlu0 %v1277_v51 }
 0xaf0   :  { %1281 = vadd.xlane.f32.xlu1 %v1280_v52 }
 0xb01   :  { %2730 = vrot.lane.b32.xlu1 %v3060_v60, %s2873_s17 }
 0xb05   :  { %2725 = vrot.lane.b32.xlu0 %v3060_v60, %s2872_s16  ;;  %2735 = vrot.lane.b32.xlu1 %v3060_v60, %s2874_s18 }
 0xb09   :  { %2740 = vrot.lane.b32.xlu0 %v2739_v54, %s2869_s2  ;;  %2745 = vrot.lane.b32.xlu1 %v2744_v56, %s2869_s2 }
 0xb0d   :  { %2755 = vrot.lane.b32.xlu1 %v2754_v57, %s2869_s2  ;;  %2750 = vrot.lane.b32.xlu0 %v2749_v58, %s2869_s2 }
 0xb74   :  { %v1483_v60 = vpop.xlane.xlu0 %1482 }
 0xb75   :  { %v1486_v59 = vpop.xlane.xlu1 %1485  ;;  %2803 = vrcp.f32 %v1483_v60 }
 0xb78   :  { %v1685_v2 = vpop.xlane.xlu0 %1684 }
 0xb79   :  { %v1688_v3 = vpop.xlane.xlu1 %1687 }
 0xb7c   :  { %v1279_v7 = vpop.xlane.xlu0 %1278 }
 0xb7d   :  { %2805 = vrcp.f32 %v1279_v7  ;;  %v1282_v8 = vpop.xlane.xlu1 %1281 }
 0xb7e   :  { %2807 = vrcp.f32 %v1282_v8 }
 0xb7f   :  { %2809 = vrcp.f32 %v1486_v59  ;;  %v2804_v1 = vpop.eup %2803 }
 0xb80   :  { %v2726_v29 = vpop.permute.xlu0 %2725  ;;  %2811 = vrcp.f32 %v1685_v2  ;;  %v1489_v18 = vmul.f32 %v2804_v1, %v2792_v39 }
 0xb81   :  { %v2728_v22 = vunpack.i.h.bf16 %v2726_v29  ;;  %v2727_v23 = vunpack.i.l.bf16 %v2726_v29  ;;  %v2731_v61 = vpop.permute.xlu1 %2730  ;;  %2813 = vrcp.f32 %v1688_v3 }
 0xb82   :  { %v2733_v14 = vunpack.i.h.bf16 %v2731_v61  ;;  %v2732_v16 = vunpack.i.l.bf16 %v2731_v61 }
 0xb83   :  { %v2598_v62 = vpack.c.bf16 %v2728_v22, %v2727_v23  ;;  %v1946_v23 = vld [vmem:[#allocation2 + $0x38] sm:$0xff] }
 0xb84   :  { %v2608_v63 = vpack.c.bf16 %v2733_v14, %v2732_v16  ;;  %v2741_v10 = vpop.permute.xlu0 %2740  ;;  %v1947_v14 = vld [vmem:[#allocation2 + $0x58] sm:$0xff] }
 0xb85   :  { %2599 = vmatprep.subr.bf16.mxu1 %v2598_v62  ;;  %v2736_v0 = vpop.permute.xlu1 %2735  ;;  %v2743_v30 = vunpack.i.h.bf16 %v2741_v10  ;;  %v2742_v31 = vunpack.i.l.bf16 %v2741_v10  ;;  %v1948_v16 = vld [vmem:[#allocation2 + $0x78] sm:$0xff] }
 0xb86   :  { %2601 = vmatpush3.bf16.msra.mxu1 %v2598_v62  ;;  %v2738_v5 = vunpack.i.h.bf16 %v2736_v0  ;;  %v2737_v6 = vunpack.i.l.bf16 %v2736_v0  ;;  %v2642_v62 = vpack.c.bf16 %v1948_v16, %v1947_v14  ;;  %v1950_v0 = vld [vmem:[#allocation2 + $0xb8] sm:$0xff] }
 0xb87   :  { %v2806_v4 = vpop.eup %2805  ;;  %2609 = vmatprep.subr.bf16.mxu1 %v2608_v63  ;;  %v2622_v15 = vpack.c.bf16 %v2743_v30, %v2742_v31 }
 0xb88   :  { %v2808_v9 = vpop.eup %2807  ;;  %v1285_v11 = vmul.f32 %v2806_v4, %v2800_v47  ;;  %v2618_v20 = vpack.c.bf16 %v2738_v5, %v2737_v6  ;;  %v2751_v35 = vpop.permute.xlu0 %2750  ;;  %v1951_v4 = vld [vmem:[#allocation2 + $0xd8] sm:$0xff] }
 0xb89   :  { %v1286_v12 = vmul.f32 %v2808_v9, %v2802_v50  ;;  %v2810_v13 = vpop.eup %2809  ;;  %v2746_v26 = vpop.permute.xlu1 %2745  ;;  %v2753_v36 = vunpack.i.h.bf16 %v2751_v35  ;;  %v2752_v37 = vunpack.i.l.bf16 %v2751_v35  ;;  %v1952_v5 = vld [vmem:[#allocation2 + $0xf8] sm:$0xff] }
 0xb8a   :  { %2365 = vmatprep.mubr.msk.f32.mxu1 %vm983_vm12, %v1285_v11  ;;  %v2812_v19 = vpop.eup %2811  ;;  %v1490_v21 = vmul.f32 %v2810_v13, %v3117_v41  ;;  %v2748_v32 = vunpack.i.h.bf16 %v2746_v26  ;;  %v2747_v33 = vunpack.i.l.bf16 %v2746_v26  ;;  %v2648_v6 = vpack.c.bf16 %v1952_v5, %v1951_v4  ;;  %v1953_v9 = vld [vmem:[#allocation2 + $0x118] sm:$0x1] }
 0xb8b   :  { %2366 = vmatmul.mubr.msk.f32.vlgmr.msra.gmra.mrb[14].mxu1 %vm983_vm12, %v1286_v12  ;;  %v2814_v24 = vpop.eup %2813  ;;  %v1691_v27 = vmul.f32 %v2812_v19, %v3122_v44  ;;  %v2630_v42 = vpack.c.bf16 %v2753_v36, %v2752_v37 }
 0xb8c   :  { %2611 = vmatpush3.bf16.msra.mxu1 %v2608_v63  ;;  %2379 = vmatprep.mubr.msk.f32.mxu1 %vm983_vm12, %v1489_v18  ;;  %v1692_v28 = vmul.f32 %v2814_v24, %v3124_v45  ;;  %v2626_v34 = vpack.c.bf16 %v2748_v32, %v2747_v33  ;;  %v1949_v63 = vld [vmem:[#allocation2 + $0x98] sm:$0xff] }
 0xb8d   :  { %2619 = vmatprep.subr.bf16.mxu1 %v2618_v20  ;;  %v2756_v38 = vpop.permute.xlu1 %2755  ;;  %v2645_v1 = vpack.c.bf16 %v1950_v0, %v1949_v63 }
 0xb8e   :  { %v2758_v39 = vunpack.i.h.bf16 %v2756_v38  ;;  %v2757_v41 = vunpack.i.l.bf16 %v2756_v38 }
 0xb8f   :  { %2380 = vmatmul.mubr.msk.f32.vlgmr.msra.gmra.mrb[16].mxu1 %vm983_vm12, %v1490_v21 }
 0xb90   :  { %2621 = vmatpush3.bf16.msra.mxu1 %v2618_v20  ;;  %2393 = vmatprep.mubr.msk.f32.mxu1 %vm983_vm12, %v1691_v27  ;;  %v2634_v43 = vpack.c.bf16 %v2758_v39, %v2757_v41 }
 0xb91   :  { %2623 = vmatprep.subr.bf16.mxu1 %v2622_v15 }
 0xb93   :  { %2394 = vmatmul.mubr.msk.f32.vlgmr.msra.gmra.mrb[18].mxu1 %vm983_vm12, %v1692_v28 }
 0xb94   :  { %2625 = vmatpush3.bf16.msra.mxu1 %v2622_v15 }
 0xb95   :  { %2627 = vmatprep.subr.bf16.mxu1 %v2626_v34 }
 0xb98   :  { %2629 = vmatpush3.bf16.msra.mxu1 %v2626_v34 }
 0xb99   :  { %2631 = vmatprep.subr.bf16.mxu1 %v2630_v42 }
 0xb9c   :  { %2633 = vmatpush3.bf16.msra.mxu1 %v2630_v42 }
 0xb9d   :  { %2635 = vmatprep.subr.bf16.mxu1 %v2634_v43 }
 0xba0   :  { %2637 = vmatpush3.bf16.msra.mxu1 %v2634_v43 }
 0xc5e   :  { %v2367_v44 = vpop.f32.mrb[14].mxu1 }
 0xc5f   :  { %1784 = vrot.lane.b32.xlu1 %v2367_v44, %s2868_s9  ;;  %v1367_v45 = vpop.f32.mrb[15].mxu1 }
 0xc60   :  { %1782 = vrot.lane.b32.xlu0 %v1367_v45, %s2868_s9 }
 0xc62   :  { %v2381_v46 = vpop.f32.mrb[16].mxu1 }
 0xc63   :  { %1792 = vrot.lane.b32.xlu1 %v2381_v46, %s2865_s23  ;;  %v1569_v47 = vpop.f32.mrb[17].mxu1 }
 0xc64   :  { %1790 = vrot.lane.b32.xlu0 %v1569_v47, %s2865_s23 }
 0xc66   :  { %v2395_v48 = vpop.f32.mrb[18].mxu1 }
 0xc67   :  { %1800 = vrot.lane.b32.xlu1 %v2395_v48, %s2871_s0  ;;  %v1771_v50 = vpop.f32.mrb[19].mxu1 }
 0xc68   :  { %1798 = vrot.lane.b32.xlu0 %v1771_v50, %s2871_s0 }
 0xc6c   :  { %1838 = vrot.lane.b32.xlu0 %v3038_v25, %s2869_s2 }
 0xcd1   :  { %v1785_v51 = vpop.permute.xlu1 %1784 }
 0xcd2   :  { %v1783_v52 = vpop.permute.xlu0 %1782  ;;  %v1805_v2 = vsel %vm983_vm12, %v3107_v17, %v1785_v51  ;;  %v2875_v17 = vmov 0.0|0.0  }
 0xcd3   :  { %v1804_v57 = vsel %vm983_vm12, %v3109_v55, %v1783_v52  ;;  %v1945_v55 = vld [vmem:[#allocation2 + $0x18] sm:$0xff]  ;;  %2638 = vmatprep.subr.bf16.mxu0 %v2875_v17 }
 0xcd4   :  { %v2639_v61 = vpack.c.bf16 %v1946_v23, %v1945_v55 }
 0xcd5   :  { %v1793_v54 = vpop.permute.xlu1 %1792 }
 0xcd6   :  { %v1791_v56 = vpop.permute.xlu0 %1790  ;;  %v1808_v7 = vsel %vm1806_vm14, %v1805_v2, %v1793_v54  ;;  %2640 = vmatpush3.bf16.msra.mxu0 %v2639_v61 }
 0xcd7   :  { %v1807_v58 = vsel %vm1806_vm14, %v1804_v57, %v1791_v56  ;;  %2641 = vmatprep.subr.bf16.mxu0 %v2875_v17 }
 0xcd9   :  { %v1801_v60 = vpop.permute.xlu1 %1800 }
 0xcda   :  { %v1799_v59 = vpop.permute.xlu0 %1798  ;;  %v1811_v25 = vsel %vm1809_vm15, %v1808_v7, %v1801_v60  ;;  %2643 = vmatpush3.bf16.msra.mxu0 %v2642_v62 }
 0xcdb   :  { %v1810_v3 = vsel %vm1809_vm15, %v1807_v58, %v1799_v59  ;;  %v1813_v22 = vsel %vm167_vm4, %v1811_v25, 1.0  ;;  %2644 = vmatprep.subr.bf16.mxu0 %v2875_v17 }
 0xcdc   :  { %v1812_v8 = vsel %vm167_vm4, %v1810_v3, 1.0 }
 0xcdd   :  { %2414 = vmatprep.mubr.msk.f32.mxu1 %vm53_vm0, %v1812_v8 }
 0xcde   :  { %v1839_v29 = vpop.permute.xlu0 %1838  ;;  %2646 = vmatpush3.bf16.msra.mxu0 %v2645_v1 }
 0xcdf   :  { %2412 = vmatprep.subr.msk.mxu1 %vm60_vm1, %v1839_v29  ;;  %2647 = vmatprep.subr.bf16.mxu0 %v2875_v17 }
 0xce0   :  { %2413 = vmatpush3.msk.msra.mxu1 %vm60_vm1, %v1839_v29 }
 0xce1   :  { %2415 = vmatmul.mubr.msk.f32.vlgmr.msra.gmra.mrb[20].mxu1 %vm53_vm0, %v1813_v22 }
 0xce2   :  { %2649 = vmatpush3.bf16.msra.mxu0 %v2648_v6 }
 0xce3   :  { %2433 = vmatprep.subr.mxu0 %v2870_v40 }
 0xce6   :  { %2434 = vmatpush3.msk.msra.mxu0 %vm60_vm1, %v1953_v9  ;;  %vm2030_vm1 = vcmask 516096  }
 0xdb4   :  { %v2416_v11 = vpop.f32.mrb[20].mxu1 }
 0xdb5   :  { %v1932_v12 = vadd.f32 %v2416_v11, %v3053_v53  ;;  %v1922_v13 = vpop.f32.mrb[21].mxu1 }
 0xdb6   :  { %v1931_v18 = vadd.f32 %v1922_v13, %v3047_v49 }
 0xdb7   :  { %v1934_v19 = vsel %vm167_vm4, %v1932_v12, 0.0 }
 0xdb8   :  { %v1933_v20 = vsel %vm167_vm4, %v1931_v18, 0.0 }
 0xdb9   :  { %v1935_v21 = vadd.f32 %v1934_v19, %v1933_v20 }
 0xdbb   :  { %v1936_v24 = vrot.slane %v1935_v21, 4 }
 0xdbd   :  { %v1937_v27 = vadd.f32 %v1936_v24, %v1935_v21 }
 0xdbf   :  { %v1938_v28 = vrot.slane %v1937_v27, 2 }
 0xdc1   :  { %v1939_v10 = vadd.f32 %v1938_v28, %v1937_v27 }
 0xdc3   :  { %v1940_v26 = vrot.slane %v1939_v10, 1 }
 0xdc5   :  { %v1941_v40 = vadd.f32 %v1940_v26, %v1939_v10 }
 0xdc7   :  { %v1943_v30 = vmul.f32 0.0625, %v1941_v40 }
 0xdc9   :  { %v1944_v31 = vsel %vm167_vm4, %v1943_v30, 1.0 }
 0xdca   :  { %2436 = vmatmul.mubr.msk.f32.vlgmr.msra.gmra.mrb[16].mxu0 %vm53_vm0, %v1944_v31 }
 0xe9d   :  { %v2026_v53 = vpop.f32.mrb[16].mxu0 }
 0xe9e   :  { %2031 = vst.msk [vmem:[%s3192_s3] sm:$0x1] %vm2030_vm1, %v2026_v53  ;;  %v2437_v49 = vpop.f32.mrb[17].mxu0 }
 0xe9f   :  { %2036 = vsyncpa [#allocation3], 1 }
 0xea0   :  { %2037 = vsyncpa [#allocation5], 1 }

</bundles_post_ra>
